<compile_context>
chip_gen: v6e
topology: v6e:2x2x1
jax: 0.10.0
libtpu: 0.0.40
codegen_flags: <defaults>
</compile_context>

<pallas_src>
import functools
import math

import jax
import jax.numpy as jnp
from jax.experimental import pallas as pl


# ----------------------------- in-kernel helpers -----------------------------

def _layer_norm(x, gamma, beta, eps):
    mu = jnp.mean(x, axis=-1, keepdims=True)
    var = jnp.mean((x - mu) ** 2, axis=-1, keepdims=True)
    return (x - mu) * jax.lax.rsqrt(var + eps) * gamma + beta


# --------------------------------- kernel ------------------------------------

def fused_transformer_kernel(num_layers, num_heads,
                             x_ref, act_ref, pos_ref, bias_ref,
                             w1s_ref, g1_ref, b1_ref,
                             w2_ref, g2_ref, b2_ref,
                             g3_ref, b3_ref,
                             wq_ref, wkT_ref, wv_ref, wo_ref, ga_ref, ba_ref,
                             wf1_ref, bf1_ref, wf2_ref, bf2_ref, gf_ref, bf_ref,
                             hw_ref, hb_ref,
                             o_ref):
    bf16 = jnp.bfloat16
    f32 = jnp.float32

    # ---------------- stem: Linear -> LN -> ReLU -> Linear -> LN -> +pos -> LN ----------
    # x is (B*L, stoch) bf16; action contribution (row-gathered W1 rows) added in f32.
    h = jnp.dot(x_ref[...], w1s_ref[...], preferred_element_type=f32) + act_ref[...]
    h = _layer_norm(h, g1_ref[...], b1_ref[...], 1e-5)        # nn.LayerNorm default eps
    h = jnp.maximum(h, 0.0)                                    # ReLU
    h = jnp.dot(h.astype(bf16), w2_ref[...], preferred_element_type=f32)
    h = _layer_norm(h, g2_ref[...], b2_ref[...], 1e-5)
    h = h + pos_ref[...]                                       # PositionalEncoding1D
    h = _layer_norm(h, g3_ref[...], b3_ref[...], 1e-6)         # self.layer_norm (eps=1e-6)

    bias = bias_ref[...]                                       # (B*L, B*L) block-diag bias
    BL, F = h.shape

    # ---------------- attention blocks (small static unroll: 2 layers x 2 heads) --------
    for l in range(num_layers):
        hb = h.astype(bf16)
        hTb = h.T.astype(bf16)          # one transpose per layer, shared by all heads
        attn_proj = jnp.zeros((BL, F), f32)

        for hh in range(num_heads):     # head-major weights -> no lane-offset slicing
            qh = jnp.dot(hb, wq_ref[l, hh], preferred_element_type=f32)   # (BL, dk); 1/sqrt(dk) folded
            kT = jnp.dot(wkT_ref[l, hh], hTb, preferred_element_type=f32) # (dk, BL); no per-head transpose
            vh = jnp.dot(hb, wv_ref[l, hh], preferred_element_type=f32)   # (BL, dk)

            # scores over the folded batch with block-diagonal additive mask bias
            s = jnp.dot(qh.astype(bf16), kT.astype(bf16),
                        preferred_element_type=f32) + bias                # (BL, BL)

            # softmax (f32) with EUP reciprocal instead of a VALU divide
            m = jnp.max(s, axis=-1, keepdims=True)
            e = jnp.exp(s - m)
            denom = jnp.sum(e, axis=-1, keepdims=True)
            a = e * pl.reciprocal(denom, approx=True)

            ho = jnp.dot(a.astype(bf16), vh.astype(bf16),
                         preferred_element_type=f32)                      # (BL, dk)
            # accumulate this head directly through its slice of Wo (no concat)
            attn_proj = attn_proj + jnp.dot(ho.astype(bf16), wo_ref[l, hh],
                                            preferred_element_type=f32)

        attn_out = _layer_norm(attn_proj + h, ga_ref[l], ba_ref[l], 1e-6)  # residual + LN

        # position-wise feed forward (residual + LN)
        ffn = jnp.dot(attn_out.astype(bf16), wf1_ref[l],
                      preferred_element_type=f32) + bf1_ref[l]
        ffn = jnp.maximum(ffn, 0.0)
        ffn = jnp.dot(ffn.astype(bf16), wf2_ref[l],
                      preferred_element_type=f32) + bf2_ref[l]
        h = _layer_norm(ffn + attn_out, gf_ref[l], bf_ref[l], 1e-6)

    # ---------------- head: Linear (with bias) ------------------------------------------
    o_ref[...] = jnp.dot(h.astype(bf16), hw_ref[...],
                         preferred_element_type=f32) + hb_ref[...]


# ------------------------------ pallas wrapper --------------------------------

def stochastic_transformer_forward(packed, samples, action, mask):
    """samples: (B, L, stoch) f32, action: (B, L) int, mask: (L, L) or (B, L, L) {0,1}."""
    B, L, stoch_dim = samples.shape
    nl, nh, F, dk = packed["wq"].shape
    stoch_out = packed["head_w"].shape[1]

    # aligned K=stoch_dim stem matmul + row-gathered action contribution (replaces one-hot/concat)
    x = samples.astype(jnp.bfloat16).reshape(B * L, stoch_dim)
    act_emb = jnp.take(packed["w1_act"], action.reshape(B * L), axis=0)    # (B*L, F) f32

    pos = jnp.tile(packed["pos"][:L], (B, 1))                              # (B*L, F)

    # block-diagonal additive attention bias over the folded (B*L, B*L) score matrix:
    # 0 where (same batch element AND mask==1), -1e9 otherwise.
    mask_b = jnp.broadcast_to(mask.astype(jnp.float32), (B, L, L))
    eye = jnp.eye(B, dtype=jnp.float32)
    keep = eye[:, None, :, None] * mask_b[:, :, None, :]                   # (B, L, B, L)
    bias = jnp.where(keep > 0.5, 0.0, -1e9).reshape(B * L, B * L)

    args = (x, act_emb, pos, bias,
            packed["w1_s"], packed["g1"], packed["b1"],
            packed["w2"], packed["g2"], packed["b2"],
            packed["g3"], packed["b3"],
            packed["wq"], packed["wkT"], packed["wv"], packed["wo"],
            packed["ga"], packed["ba"],
            packed["wf1"], packed["bf1"], packed["wf2"], packed["bf2"],
            packed["gf"], packed["bf"],
            packed["head_w"], packed["head_b"])

    # Single invocation (no grid): every array is one resident VMEM block; total
    # footprint is tens of KB, far below any generation's VMEM limit.
    # Note: output lane width is structurally limited by stoch_dim=32 (~2 KB total store).
    out = pl.pallas_call(
        functools.partial(fused_transformer_kernel, nl, nh),
        out_shape=jax.ShapeDtypeStruct((B * L, stoch_out), jnp.float32),
    )(*args)
    return out.reshape(B, L, stoch_out)


# ------------------------------- parameters -----------------------------------

def init_params(key, stoch_dim, action_dim, feat_dim, num_layers, num_heads, max_length):
    """Raw parameters in math layout: Linear weights stored (in_features, out_features)."""
    d_in = stoch_dim + action_dim
    hidden = feat_dim * 2
    keys = jax.random.split(key, 13)
    ki = iter(keys)

    def lin(k, fan_in, shape):
        bound = 1.0 / math.sqrt(fan_in)
        return jax.random.uniform(k, shape, jnp.float32, -bound, bound)

    ones = lambda s: jnp.ones(s, jnp.float32)
    zeros = lambda s: jnp.zeros(s, jnp.float32)
    nl = num_layers
    return {
        # stem
        "stem_w1": lin(next(ki), d_in, (d_in, feat_dim)),
        "stem_g1": ones((1, feat_dim)), "stem_b1": zeros((1, feat_dim)),
        "stem_w2": lin(next(ki), feat_dim, (feat_dim, feat_dim)),
        "stem_g2": ones((1, feat_dim)), "stem_b2": zeros((1, feat_dim)),
        "pos_emb": jax.random.normal(next(ki), (max_length, feat_dim), jnp.float32),
        "ln_g": ones((1, feat_dim)), "ln_b": zeros((1, feat_dim)),
        # attention blocks, stacked along leading num_layers axis
        "wq": lin(next(ki), feat_dim, (nl, feat_dim, feat_dim)),
        "wk": lin(next(ki), feat_dim, (nl, feat_dim, feat_dim)),
        "wv": lin(next(ki), feat_dim, (nl, feat_dim, feat_dim)),
        "wo": lin(next(ki), feat_dim, (nl, feat_dim, feat_dim)),
        "ga": ones((nl, 1, feat_dim)), "ba": zeros((nl, 1, feat_dim)),
        "wf1": lin(next(ki), feat_dim, (nl, feat_dim, hidden)),
        "bf1": lin(next(ki), feat_dim, (nl, 1, hidden)),
        "wf2": lin(next(ki), hidden, (nl, hidden, feat_dim)),
        "bf2": lin(next(ki), hidden, (nl, 1, feat_dim)),
        "gf": ones((nl, 1, feat_dim)), "bf": zeros((nl, 1, feat_dim)),
        # head
        "head_w": lin(next(ki), feat_dim, (feat_dim, stoch_dim)),
        "head_b": lin(next(ki), feat_dim, (1, stoch_dim)),
    }


def pack_params(p, stoch_dim, num_heads):
    """Kernel-layout packing: head-major QKV/O, pre-transposed K, scale fold, bf16 weights."""
    bf16 = jnp.bfloat16
    nl, F, _ = p["wq"].shape
    dk = F // num_heads
    scale = 1.0 / math.sqrt(dk)

    def head_cols(w):  # (nl, F, nh*dk) -> (nl, nh, F, dk); column block hh belongs to head hh
        return w.reshape(nl, F, num_heads, dk).transpose(0, 2, 1, 3)

    return {
        # stem: split W1 into the stoch part (matmul) and the action part (row-gather table)
        "w1_s": p["stem_w1"][:stoch_dim].astype(bf16),
        "w1_act": p["stem_w1"][stoch_dim:],                                  # f32
        "g1": p["stem_g1"], "b1": p["stem_b1"],
        "w2": p["stem_w2"].astype(bf16),
        "g2": p["stem_g2"], "b2": p["stem_b2"],
        "pos": p["pos_emb"],
        "g3": p["ln_g"], "b3": p["ln_b"],
        # attention: head-major, 1/sqrt(dk) folded into Q, K pre-transposed to (dk, F)
        "wq": head_cols(p["wq"] * scale).astype(bf16),                        # (nl, nh, F, dk)
        "wkT": head_cols(p["wk"]).transpose(0, 1, 3, 2).astype(bf16),         # (nl, nh, dk, F)
        "wv": head_cols(p["wv"]).astype(bf16),                                # (nl, nh, F, dk)
        "wo": p["wo"].reshape(nl, num_heads, dk, F).astype(bf16),             # (nl, nh, dk, F)
        "ga": p["ga"], "ba": p["ba"],
        "wf1": p["wf1"].astype(bf16), "bf1": p["bf1"],
        "wf2": p["wf2"].astype(bf16), "bf2": p["bf2"],
        "gf": p["gf"], "bf": p["bf"],
        "head_w": p["head_w"].astype(bf16), "head_b": p["head_b"],
    }


# ----------------------------------- main --------------------------------------

if __name__ == "__main__":
    stoch_dim = 32
    action_dim = 4
    feat_dim = 32
    num_layers = 2
    num_heads = 2
    max_length = 16
    B, L = 2, 8

    key = jax.random.PRNGKey(0)
    kp, ks, ka = jax.random.split(key, 3)

    raw = init_params(kp, stoch_dim, action_dim, feat_dim,
                      num_layers, num_heads, max_length)
    packed = pack_params(raw, stoch_dim, num_heads)

    samples = jax.random.normal(ks, (B, L, stoch_dim), jnp.float32)
    action = jax.random.randint(ka, (B, L), 0, action_dim, jnp.int32)
    # causal (subsequent) mask shared across the batch: 1 = attend, 0 = masked
    mask = jnp.tril(jnp.ones((L, L), jnp.float32))

    fwd = jax.jit(stochastic_transformer_forward)
    out = jax.block_until_ready(fwd(packed, samples, action, mask))
    assert out.shape == (B, L, stoch_dim)
    assert bool(jnp.all(jnp.isfinite(out)))
    print("KERNEL_OK")
</pallas_src>

<mosaic_0001>
module attributes {stable_mosaic.version = 11 : i64} {
  func.func @fused_transformer_kernel(%arg0: memref<16x32xbf16, #tpu.memory_space<vmem>>, %arg1: memref<16x32xf32, #tpu.memory_space<vmem>>, %arg2: memref<16x32xf32, #tpu.memory_space<vmem>>, %arg3: memref<16x16xf32, #tpu.memory_space<vmem>>, %arg4: memref<32x32xbf16, #tpu.memory_space<vmem>>, %arg5: memref<1x32xf32, #tpu.memory_space<vmem>>, %arg6: memref<1x32xf32, #tpu.memory_space<vmem>>, %arg7: memref<32x32xbf16, #tpu.memory_space<vmem>>, %arg8: memref<1x32xf32, #tpu.memory_space<vmem>>, %arg9: memref<1x32xf32, #tpu.memory_space<vmem>>, %arg10: memref<1x32xf32, #tpu.memory_space<vmem>>, %arg11: memref<1x32xf32, #tpu.memory_space<vmem>>, %arg12: memref<2x2x32x16xbf16, #tpu.memory_space<vmem>>, %arg13: memref<2x2x16x32xbf16, #tpu.memory_space<vmem>>, %arg14: memref<2x2x32x16xbf16, #tpu.memory_space<vmem>>, %arg15: memref<2x2x16x32xbf16, #tpu.memory_space<vmem>>, %arg16: memref<2x1x32xf32, #tpu.memory_space<vmem>>, %arg17: memref<2x1x32xf32, #tpu.memory_space<vmem>>, %arg18: memref<2x32x64xbf16, #tpu.memory_space<vmem>>, %arg19: memref<2x1x64xf32, #tpu.memory_space<vmem>>, %arg20: memref<2x64x32xbf16, #tpu.memory_space<vmem>>, %arg21: memref<2x1x32xf32, #tpu.memory_space<vmem>>, %arg22: memref<2x1x32xf32, #tpu.memory_space<vmem>>, %arg23: memref<2x1x32xf32, #tpu.memory_space<vmem>>, %arg24: memref<32x32xbf16, #tpu.memory_space<vmem>>, %arg25: memref<1x32xf32, #tpu.memory_space<vmem>>, %arg26: memref<16x32xf32, #tpu.memory_space<vmem>>) attributes {dimension_semantics = [], scalar_prefetch = 0 : i64, scratch_operands = 0 : i64, tpu.core_type = #tpu.core_type<tc>} {
    %c0 = arith.constant 0 : index
    %c0_0 = arith.constant 0 : index
    %0 = vector.load %arg0[%c0, %c0_0] : memref<16x32xbf16, #tpu.memory_space<vmem>>, vector<16x32xbf16>
    %c0_1 = arith.constant 0 : index
    %c0_2 = arith.constant 0 : index
    %1 = vector.load %arg4[%c0_1, %c0_2] : memref<32x32xbf16, #tpu.memory_space<vmem>>, vector<32x32xbf16>
    %cst = arith.constant dense<0.000000e+00> : vector<16x32xf32>
    %2 = tpu.matmul %0, %1, %cst {dimension_numbers = #tpu.dot_dimension_numbers<[1], [0], [0], [1], [0, 0, 1, 1], [], []>} : vector<16x32xbf16>, vector<32x32xbf16>, vector<16x32xf32> -> vector<16x32xf32>
    %c0_3 = arith.constant 0 : index
    %c0_4 = arith.constant 0 : index
    %3 = vector.load %arg1[%c0_3, %c0_4] : memref<16x32xf32, #tpu.memory_space<vmem>>, vector<16x32xf32>
    %4 = arith.addf %2, %3 : vector<16x32xf32>
    %c0_5 = arith.constant 0 : index
    %c0_6 = arith.constant 0 : index
    %5 = vector.load %arg5[%c0_5, %c0_6] : memref<1x32xf32, #tpu.memory_space<vmem>>, vector<1x32xf32>
    %c0_7 = arith.constant 0 : index
    %c0_8 = arith.constant 0 : index
    %6 = vector.load %arg6[%c0_7, %c0_8] : memref<1x32xf32, #tpu.memory_space<vmem>>, vector<1x32xf32>
    %cst_9 = arith.constant dense<0.000000e+00> : vector<16xf32>
    %7 = vector.multi_reduction <add>, %4, %cst_9 [1] : vector<16x32xf32> to vector<16xf32>
    %8 = vector.shape_cast %7 : vector<16xf32> to vector<16x1xf32>
    %cst_10 = arith.constant 3.200000e+01 : f32
    %9 = vector.broadcast %cst_10 : f32 to vector<16x1xf32>
    %10 = arith.divf %8, %9 : vector<16x1xf32>
    %11 = vector.broadcast %10 : vector<16x1xf32> to vector<16x32xf32>
    %12 = arith.subf %4, %11 : vector<16x32xf32>
    %13 = arith.mulf %12, %12 : vector<16x32xf32>
    %cst_11 = arith.constant dense<0.000000e+00> : vector<16xf32>
    %14 = vector.multi_reduction <add>, %13, %cst_11 [1] : vector<16x32xf32> to vector<16xf32>
    %15 = vector.shape_cast %14 : vector<16xf32> to vector<16x1xf32>
    %cst_12 = arith.constant 3.200000e+01 : f32
    %16 = vector.broadcast %cst_12 : f32 to vector<16x1xf32>
    %17 = arith.divf %15, %16 : vector<16x1xf32>
    %18 = vector.broadcast %10 : vector<16x1xf32> to vector<16x32xf32>
    %19 = arith.subf %4, %18 : vector<16x32xf32>
    %cst_13 = arith.constant 9.99999974E-6 : f32
    %20 = vector.broadcast %cst_13 : f32 to vector<16x1xf32>
    %21 = arith.addf %17, %20 : vector<16x1xf32>
    %22 = math.rsqrt %21 : vector<16x1xf32>
    %23 = vector.broadcast %22 : vector<16x1xf32> to vector<16x32xf32>
    %24 = arith.mulf %19, %23 : vector<16x32xf32>
    %25 = vector.broadcast %5 : vector<1x32xf32> to vector<16x32xf32>
    %26 = arith.mulf %24, %25 : vector<16x32xf32>
    %27 = vector.broadcast %6 : vector<1x32xf32> to vector<16x32xf32>
    %28 = arith.addf %26, %27 : vector<16x32xf32>
    %cst_14 = arith.constant 0.000000e+00 : f32
    %29 = vector.broadcast %cst_14 : f32 to vector<16x32xf32>
    %30 = arith.maximumf %28, %29 : vector<16x32xf32>
    %31 = arith.truncf %30 : vector<16x32xf32> to vector<16x32xbf16>
    %c0_15 = arith.constant 0 : index
    %c0_16 = arith.constant 0 : index
    %32 = vector.load %arg7[%c0_15, %c0_16] : memref<32x32xbf16, #tpu.memory_space<vmem>>, vector<32x32xbf16>
    %cst_17 = arith.constant dense<0.000000e+00> : vector<16x32xf32>
    %33 = tpu.matmul %31, %32, %cst_17 {dimension_numbers = #tpu.dot_dimension_numbers<[1], [0], [0], [1], [0, 0, 1, 1], [], []>} : vector<16x32xbf16>, vector<32x32xbf16>, vector<16x32xf32> -> vector<16x32xf32>
    %c0_18 = arith.constant 0 : index
    %c0_19 = arith.constant 0 : index
    %34 = vector.load %arg8[%c0_18, %c0_19] : memref<1x32xf32, #tpu.memory_space<vmem>>, vector<1x32xf32>
    %c0_20 = arith.constant 0 : index
    %c0_21 = arith.constant 0 : index
    %35 = vector.load %arg9[%c0_20, %c0_21] : memref<1x32xf32, #tpu.memory_space<vmem>>, vector<1x32xf32>
    %cst_22 = arith.constant dense<0.000000e+00> : vector<16xf32>
    %36 = vector.multi_reduction <add>, %33, %cst_22 [1] : vector<16x32xf32> to vector<16xf32>
    %37 = vector.shape_cast %36 : vector<16xf32> to vector<16x1xf32>
    %cst_23 = arith.constant 3.200000e+01 : f32
    %38 = vector.broadcast %cst_23 : f32 to vector<16x1xf32>
    %39 = arith.divf %37, %38 : vector<16x1xf32>
    %40 = vector.broadcast %39 : vector<16x1xf32> to vector<16x32xf32>
    %41 = arith.subf %33, %40 : vector<16x32xf32>
    %42 = arith.mulf %41, %41 : vector<16x32xf32>
    %cst_24 = arith.constant dense<0.000000e+00> : vector<16xf32>
    %43 = vector.multi_reduction <add>, %42, %cst_24 [1] : vector<16x32xf32> to vector<16xf32>
    %44 = vector.shape_cast %43 : vector<16xf32> to vector<16x1xf32>
    %cst_25 = arith.constant 3.200000e+01 : f32
    %45 = vector.broadcast %cst_25 : f32 to vector<16x1xf32>
    %46 = arith.divf %44, %45 : vector<16x1xf32>
    %47 = vector.broadcast %39 : vector<16x1xf32> to vector<16x32xf32>
    %48 = arith.subf %33, %47 : vector<16x32xf32>
    %cst_26 = arith.constant 9.99999974E-6 : f32
    %49 = vector.broadcast %cst_26 : f32 to vector<16x1xf32>
    %50 = arith.addf %46, %49 : vector<16x1xf32>
    %51 = math.rsqrt %50 : vector<16x1xf32>
    %52 = vector.broadcast %51 : vector<16x1xf32> to vector<16x32xf32>
    %53 = arith.mulf %48, %52 : vector<16x32xf32>
    %54 = vector.broadcast %34 : vector<1x32xf32> to vector<16x32xf32>
    %55 = arith.mulf %53, %54 : vector<16x32xf32>
    %56 = vector.broadcast %35 : vector<1x32xf32> to vector<16x32xf32>
    %57 = arith.addf %55, %56 : vector<16x32xf32>
    %c0_27 = arith.constant 0 : index
    %c0_28 = arith.constant 0 : index
    %58 = vector.load %arg2[%c0_27, %c0_28] : memref<16x32xf32, #tpu.memory_space<vmem>>, vector<16x32xf32>
    %59 = arith.addf %57, %58 : vector<16x32xf32>
    %c0_29 = arith.constant 0 : index
    %c0_30 = arith.constant 0 : index
    %60 = vector.load %arg10[%c0_29, %c0_30] : memref<1x32xf32, #tpu.memory_space<vmem>>, vector<1x32xf32>
    %c0_31 = arith.constant 0 : index
    %c0_32 = arith.constant 0 : index
    %61 = vector.load %arg11[%c0_31, %c0_32] : memref<1x32xf32, #tpu.memory_space<vmem>>, vector<1x32xf32>
    %cst_33 = arith.constant dense<0.000000e+00> : vector<16xf32>
    %62 = vector.multi_reduction <add>, %59, %cst_33 [1] : vector<16x32xf32> to vector<16xf32>
    %63 = vector.shape_cast %62 : vector<16xf32> to vector<16x1xf32>
    %cst_34 = arith.constant 3.200000e+01 : f32
    %64 = vector.broadcast %cst_34 : f32 to vector<16x1xf32>
    %65 = arith.divf %63, %64 : vector<16x1xf32>
    %66 = vector.broadcast %65 : vector<16x1xf32> to vector<16x32xf32>
    %67 = arith.subf %59, %66 : vector<16x32xf32>
    %68 = arith.mulf %67, %67 : vector<16x32xf32>
    %cst_35 = arith.constant dense<0.000000e+00> : vector<16xf32>
    %69 = vector.multi_reduction <add>, %68, %cst_35 [1] : vector<16x32xf32> to vector<16xf32>
    %70 = vector.shape_cast %69 : vector<16xf32> to vector<16x1xf32>
    %cst_36 = arith.constant 3.200000e+01 : f32
    %71 = vector.broadcast %cst_36 : f32 to vector<16x1xf32>
    %72 = arith.divf %70, %71 : vector<16x1xf32>
    %73 = vector.broadcast %65 : vector<16x1xf32> to vector<16x32xf32>
    %74 = arith.subf %59, %73 : vector<16x32xf32>
    %cst_37 = arith.constant 9.99999997E-7 : f32
    %75 = vector.broadcast %cst_37 : f32 to vector<16x1xf32>
    %76 = arith.addf %72, %75 : vector<16x1xf32>
    %77 = math.rsqrt %76 : vector<16x1xf32>
    %78 = vector.broadcast %77 : vector<16x1xf32> to vector<16x32xf32>
    %79 = arith.mulf %74, %78 : vector<16x32xf32>
    %80 = vector.broadcast %60 : vector<1x32xf32> to vector<16x32xf32>
    %81 = arith.mulf %79, %80 : vector<16x32xf32>
    %82 = vector.broadcast %61 : vector<1x32xf32> to vector<16x32xf32>
    %83 = arith.addf %81, %82 : vector<16x32xf32>
    %c0_38 = arith.constant 0 : index
    %c0_39 = arith.constant 0 : index
    %84 = vector.load %arg3[%c0_38, %c0_39] : memref<16x16xf32, #tpu.memory_space<vmem>>, vector<16x16xf32>
    %85 = vector.shape_cast %84 : vector<16x16xf32> to vector<16x16xf32>
    %86 = arith.truncf %83 : vector<16x32xf32> to vector<16x32xbf16>
    %87 = tpu.transpose %83, [1, 0] : vector<16x32xf32> -> vector<32x16xf32>
    %88 = arith.truncf %87 : vector<32x16xf32> to vector<32x16xbf16>
    %cst_40 = arith.constant 0.000000e+00 : f32
    %89 = vector.broadcast %cst_40 : f32 to vector<16x32xf32>
    %c0_41 = arith.constant 0 : index
    %c0_42 = arith.constant 0 : index
    %c0_43 = arith.constant 0 : index
    %c0_44 = arith.constant 0 : index
    %90 = vector.load %arg12[%c0_41, %c0_42, %c0_43, %c0_44] : memref<2x2x32x16xbf16, #tpu.memory_space<vmem>>, vector<1x1x32x16xbf16>
    %91 = vector.shape_cast %90 : vector<1x1x32x16xbf16> to vector<32x16xbf16>
    %cst_45 = arith.constant dense<0.000000e+00> : vector<16x16xf32>
    %92 = tpu.matmul %86, %91, %cst_45 {dimension_numbers = #tpu.dot_dimension_numbers<[1], [0], [0], [1], [0, 0, 1, 1], [], []>} : vector<16x32xbf16>, vector<32x16xbf16>, vector<16x16xf32> -> vector<16x16xf32>
    %c0_46 = arith.constant 0 : index
    %c0_47 = arith.constant 0 : index
    %c0_48 = arith.constant 0 : index
    %c0_49 = arith.constant 0 : index
    %93 = vector.load %arg13[%c0_46, %c0_47, %c0_48, %c0_49] : memref<2x2x16x32xbf16, #tpu.memory_space<vmem>>, vector<1x1x16x32xbf16>
    %94 = vector.shape_cast %93 : vector<1x1x16x32xbf16> to vector<16x32xbf16>
    %cst_50 = arith.constant dense<0.000000e+00> : vector<16x16xf32>
    %95 = tpu.matmul %94, %88, %cst_50 {dimension_numbers = #tpu.dot_dimension_numbers<[1], [0], [0], [1], [0, 0, 1, 1], [], []>} : vector<16x32xbf16>, vector<32x16xbf16>, vector<16x16xf32> -> vector<16x16xf32>
    %c0_51 = arith.constant 0 : index
    %c0_52 = arith.constant 0 : index
    %c0_53 = arith.constant 0 : index
    %c0_54 = arith.constant 0 : index
    %96 = vector.load %arg14[%c0_51, %c0_52, %c0_53, %c0_54] : memref<2x2x32x16xbf16, #tpu.memory_space<vmem>>, vector<1x1x32x16xbf16>
    %97 = vector.shape_cast %96 : vector<1x1x32x16xbf16> to vector<32x16xbf16>
    %cst_55 = arith.constant dense<0.000000e+00> : vector<16x16xf32>
    %98 = tpu.matmul %86, %97, %cst_55 {dimension_numbers = #tpu.dot_dimension_numbers<[1], [0], [0], [1], [0, 0, 1, 1], [], []>} : vector<16x32xbf16>, vector<32x16xbf16>, vector<16x16xf32> -> vector<16x16xf32>
    %99 = arith.truncf %92 : vector<16x16xf32> to vector<16x16xbf16>
    %100 = arith.truncf %95 : vector<16x16xf32> to vector<16x16xbf16>
    %cst_56 = arith.constant dense<0.000000e+00> : vector<16x16xf32>
    %101 = tpu.matmul %99, %100, %cst_56 {dimension_numbers = #tpu.dot_dimension_numbers<[1], [0], [0], [1], [0, 0, 1, 1], [], []>} : vector<16x16xbf16>, vector<16x16xbf16>, vector<16x16xf32> -> vector<16x16xf32>
    %102 = arith.addf %101, %85 : vector<16x16xf32>
    %cst_57 = arith.constant dense<0xFF800000> : vector<16xf32>
    %103 = vector.multi_reduction <maximumf>, %102, %cst_57 [1] : vector<16x16xf32> to vector<16xf32>
    %104 = vector.shape_cast %103 : vector<16xf32> to vector<16x1xf32>
    %105 = vector.broadcast %104 : vector<16x1xf32> to vector<16x16xf32>
    %106 = arith.subf %102, %105 : vector<16x16xf32>
    %107 = math.exp %106 : vector<16x16xf32>
    %cst_58 = arith.constant dense<0.000000e+00> : vector<16xf32>
    %108 = vector.multi_reduction <add>, %107, %cst_58 [1] : vector<16x16xf32> to vector<16xf32>
    %109 = vector.shape_cast %108 : vector<16xf32> to vector<16x1xf32>
    %110 = tpu.reciprocal %109 {approx = true} : vector<16x1xf32> -> vector<16x1xf32>
    %111 = vector.broadcast %110 : vector<16x1xf32> to vector<16x16xf32>
    %112 = arith.mulf %107, %111 : vector<16x16xf32>
    %113 = arith.truncf %112 : vector<16x16xf32> to vector<16x16xbf16>
    %114 = arith.truncf %98 : vector<16x16xf32> to vector<16x16xbf16>
    %cst_59 = arith.constant dense<0.000000e+00> : vector<16x16xf32>
    %115 = tpu.matmul %113, %114, %cst_59 {dimension_numbers = #tpu.dot_dimension_numbers<[1], [0], [0], [1], [0, 0, 1, 1], [], []>} : vector<16x16xbf16>, vector<16x16xbf16>, vector<16x16xf32> -> vector<16x16xf32>
    %116 = arith.truncf %115 : vector<16x16xf32> to vector<16x16xbf16>
    %c0_60 = arith.constant 0 : index
    %c0_61 = arith.constant 0 : index
    %c0_62 = arith.constant 0 : index
    %c0_63 = arith.constant 0 : index
    %117 = vector.load %arg15[%c0_60, %c0_61, %c0_62, %c0_63] : memref<2x2x16x32xbf16, #tpu.memory_space<vmem>>, vector<1x1x16x32xbf16>
    %118 = vector.shape_cast %117 : vector<1x1x16x32xbf16> to vector<16x32xbf16>
    %cst_64 = arith.constant dense<0.000000e+00> : vector<16x32xf32>
    %119 = tpu.matmul %116, %118, %cst_64 {dimension_numbers = #tpu.dot_dimension_numbers<[1], [0], [0], [1], [0, 0, 1, 1], [], []>} : vector<16x16xbf16>, vector<16x32xbf16>, vector<16x32xf32> -> vector<16x32xf32>
    %120 = arith.addf %89, %119 : vector<16x32xf32>
    %c0_65 = arith.constant 0 : index
    %c1 = arith.constant 1 : index
    %c0_66 = arith.constant 0 : index
    %c0_67 = arith.constant 0 : index
    %121 = vector.load %arg12[%c0_65, %c1, %c0_66, %c0_67] : memref<2x2x32x16xbf16, #tpu.memory_space<vmem>>, vector<1x1x32x16xbf16>
    %122 = vector.shape_cast %121 : vector<1x1x32x16xbf16> to vector<32x16xbf16>
    %cst_68 = arith.constant dense<0.000000e+00> : vector<16x16xf32>
    %123 = tpu.matmul %86, %122, %cst_68 {dimension_numbers = #tpu.dot_dimension_numbers<[1], [0], [0], [1], [0, 0, 1, 1], [], []>} : vector<16x32xbf16>, vector<32x16xbf16>, vector<16x16xf32> -> vector<16x16xf32>
    %c0_69 = arith.constant 0 : index
    %c1_70 = arith.constant 1 : index
    %c0_71 = arith.constant 0 : index
    %c0_72 = arith.constant 0 : index
    %124 = vector.load %arg13[%c0_69, %c1_70, %c0_71, %c0_72] : memref<2x2x16x32xbf16, #tpu.memory_space<vmem>>, vector<1x1x16x32xbf16>
    %125 = vector.shape_cast %124 : vector<1x1x16x32xbf16> to vector<16x32xbf16>
    %cst_73 = arith.constant dense<0.000000e+00> : vector<16x16xf32>
    %126 = tpu.matmul %125, %88, %cst_73 {dimension_numbers = #tpu.dot_dimension_numbers<[1], [0], [0], [1], [0, 0, 1, 1], [], []>} : vector<16x32xbf16>, vector<32x16xbf16>, vector<16x16xf32> -> vector<16x16xf32>
    %c0_74 = arith.constant 0 : index
    %c1_75 = arith.constant 1 : index
    %c0_76 = arith.constant 0 : index
    %c0_77 = arith.constant 0 : index
    %127 = vector.load %arg14[%c0_74, %c1_75, %c0_76, %c0_77] : memref<2x2x32x16xbf16, #tpu.memory_space<vmem>>, vector<1x1x32x16xbf16>
    %128 = vector.shape_cast %127 : vector<1x1x32x16xbf16> to vector<32x16xbf16>
    %cst_78 = arith.constant dense<0.000000e+00> : vector<16x16xf32>
    %129 = tpu.matmul %86, %128, %cst_78 {dimension_numbers = #tpu.dot_dimension_numbers<[1], [0], [0], [1], [0, 0, 1, 1], [], []>} : vector<16x32xbf16>, vector<32x16xbf16>, vector<16x16xf32> -> vector<16x16xf32>
    %130 = arith.truncf %123 : vector<16x16xf32> to vector<16x16xbf16>
    %131 = arith.truncf %126 : vector<16x16xf32> to vector<16x16xbf16>
    %cst_79 = arith.constant dense<0.000000e+00> : vector<16x16xf32>
    %132 = tpu.matmul %130, %131, %cst_79 {dimension_numbers = #tpu.dot_dimension_numbers<[1], [0], [0], [1], [0, 0, 1, 1], [], []>} : vector<16x16xbf16>, vector<16x16xbf16>, vector<16x16xf32> -> vector<16x16xf32>
    %133 = arith.addf %132, %85 : vector<16x16xf32>
    %cst_80 = arith.constant dense<0xFF800000> : vector<16xf32>
    %134 = vector.multi_reduction <maximumf>, %133, %cst_80 [1] : vector<16x16xf32> to vector<16xf32>
    %135 = vector.shape_cast %134 : vector<16xf32> to vector<16x1xf32>
    %136 = vector.broadcast %135 : vector<16x1xf32> to vector<16x16xf32>
    %137 = arith.subf %133, %136 : vector<16x16xf32>
    %138 = math.exp %137 : vector<16x16xf32>
    %cst_81 = arith.constant dense<0.000000e+00> : vector<16xf32>
    %139 = vector.multi_reduction <add>, %138, %cst_81 [1] : vector<16x16xf32> to vector<16xf32>
    %140 = vector.shape_cast %139 : vector<16xf32> to vector<16x1xf32>
    %141 = tpu.reciprocal %140 {approx = true} : vector<16x1xf32> -> vector<16x1xf32>
    %142 = vector.broadcast %141 : vector<16x1xf32> to vector<16x16xf32>
    %143 = arith.mulf %138, %142 : vector<16x16xf32>
    %144 = arith.truncf %143 : vector<16x16xf32> to vector<16x16xbf16>
    %145 = arith.truncf %129 : vector<16x16xf32> to vector<16x16xbf16>
    %cst_82 = arith.constant dense<0.000000e+00> : vector<16x16xf32>
    %146 = tpu.matmul %144, %145, %cst_82 {dimension_numbers = #tpu.dot_dimension_numbers<[1], [0], [0], [1], [0, 0, 1, 1], [], []>} : vector<16x16xbf16>, vector<16x16xbf16>, vector<16x16xf32> -> vector<16x16xf32>
    %147 = arith.truncf %146 : vector<16x16xf32> to vector<16x16xbf16>
    %c0_83 = arith.constant 0 : index
    %c1_84 = arith.constant 1 : index
    %c0_85 = arith.constant 0 : index
    %c0_86 = arith.constant 0 : index
    %148 = vector.load %arg15[%c0_83, %c1_84, %c0_85, %c0_86] : memref<2x2x16x32xbf16, #tpu.memory_space<vmem>>, vector<1x1x16x32xbf16>
    %149 = vector.shape_cast %148 : vector<1x1x16x32xbf16> to vector<16x32xbf16>
    %cst_87 = arith.constant dense<0.000000e+00> : vector<16x32xf32>
    %150 = tpu.matmul %147, %149, %cst_87 {dimension_numbers = #tpu.dot_dimension_numbers<[1], [0], [0], [1], [0, 0, 1, 1], [], []>} : vector<16x16xbf16>, vector<16x32xbf16>, vector<16x32xf32> -> vector<16x32xf32>
    %151 = arith.addf %120, %150 : vector<16x32xf32>
    %152 = arith.addf %151, %83 : vector<16x32xf32>
    %c0_88 = arith.constant 0 : index
    %c0_89 = arith.constant 0 : index
    %c0_90 = arith.constant 0 : index
    %153 = vector.load %arg16[%c0_88, %c0_89, %c0_90] : memref<2x1x32xf32, #tpu.memory_space<vmem>>, vector<1x1x32xf32>
    %154 = vector.shape_cast %153 : vector<1x1x32xf32> to vector<1x32xf32>
    %c0_91 = arith.constant 0 : index
    %c0_92 = arith.constant 0 : index
    %c0_93 = arith.constant 0 : index
    %155 = vector.load %arg17[%c0_91, %c0_92, %c0_93] : memref<2x1x32xf32, #tpu.memory_space<vmem>>, vector<1x1x32xf32>
    %156 = vector.shape_cast %155 : vector<1x1x32xf32> to vector<1x32xf32>
    %cst_94 = arith.constant dense<0.000000e+00> : vector<16xf32>
    %157 = vector.multi_reduction <add>, %152, %cst_94 [1] : vector<16x32xf32> to vector<16xf32>
    %158 = vector.shape_cast %157 : vector<16xf32> to vector<16x1xf32>
    %cst_95 = arith.constant 3.200000e+01 : f32
    %159 = vector.broadcast %cst_95 : f32 to vector<16x1xf32>
    %160 = arith.divf %158, %159 : vector<16x1xf32>
    %161 = vector.broadcast %160 : vector<16x1xf32> to vector<16x32xf32>
    %162 = arith.subf %152, %161 : vector<16x32xf32>
    %163 = arith.mulf %162, %162 : vector<16x32xf32>
    %cst_96 = arith.constant dense<0.000000e+00> : vector<16xf32>
    %164 = vector.multi_reduction <add>, %163, %cst_96 [1] : vector<16x32xf32> to vector<16xf32>
    %165 = vector.shape_cast %164 : vector<16xf32> to vector<16x1xf32>
    %cst_97 = arith.constant 3.200000e+01 : f32
    %166 = vector.broadcast %cst_97 : f32 to vector<16x1xf32>
    %167 = arith.divf %165, %166 : vector<16x1xf32>
    %168 = vector.broadcast %160 : vector<16x1xf32> to vector<16x32xf32>
    %169 = arith.subf %152, %168 : vector<16x32xf32>
    %cst_98 = arith.constant 9.99999997E-7 : f32
    %170 = vector.broadcast %cst_98 : f32 to vector<16x1xf32>
    %171 = arith.addf %167, %170 : vector<16x1xf32>
    %172 = math.rsqrt %171 : vector<16x1xf32>
    %173 = vector.broadcast %172 : vector<16x1xf32> to vector<16x32xf32>
    %174 = arith.mulf %169, %173 : vector<16x32xf32>
    %175 = vector.broadcast %154 : vector<1x32xf32> to vector<16x32xf32>
    %176 = arith.mulf %174, %175 : vector<16x32xf32>
    %177 = vector.broadcast %156 : vector<1x32xf32> to vector<16x32xf32>
    %178 = arith.addf %176, %177 : vector<16x32xf32>
    %179 = arith.truncf %178 : vector<16x32xf32> to vector<16x32xbf16>
    %c0_99 = arith.constant 0 : index
    %c0_100 = arith.constant 0 : index
    %c0_101 = arith.constant 0 : index
    %180 = vector.load %arg18[%c0_99, %c0_100, %c0_101] : memref<2x32x64xbf16, #tpu.memory_space<vmem>>, vector<1x32x64xbf16>
    %181 = vector.shape_cast %180 : vector<1x32x64xbf16> to vector<32x64xbf16>
    %cst_102 = arith.constant dense<0.000000e+00> : vector<16x64xf32>
    %182 = tpu.matmul %179, %181, %cst_102 {dimension_numbers = #tpu.dot_dimension_numbers<[1], [0], [0], [1], [0, 0, 1, 1], [], []>} : vector<16x32xbf16>, vector<32x64xbf16>, vector<16x64xf32> -> vector<16x64xf32>
    %c0_103 = arith.constant 0 : index
    %c0_104 = arith.constant 0 : index
    %c0_105 = arith.constant 0 : index
    %183 = vector.load %arg19[%c0_103, %c0_104, %c0_105] : memref<2x1x64xf32, #tpu.memory_space<vmem>>, vector<1x1x64xf32>
    %184 = vector.shape_cast %183 : vector<1x1x64xf32> to vector<1x64xf32>
    %185 = vector.broadcast %184 : vector<1x64xf32> to vector<16x64xf32>
    %186 = arith.addf %182, %185 : vector<16x64xf32>
    %cst_106 = arith.constant 0.000000e+00 : f32
    %187 = vector.broadcast %cst_106 : f32 to vector<16x64xf32>
    %188 = arith.maximumf %186, %187 : vector<16x64xf32>
    %189 = arith.truncf %188 : vector<16x64xf32> to vector<16x64xbf16>
    %c0_107 = arith.constant 0 : index
    %c0_108 = arith.constant 0 : index
    %c0_109 = arith.constant 0 : index
    %190 = vector.load %arg20[%c0_107, %c0_108, %c0_109] : memref<2x64x32xbf16, #tpu.memory_space<vmem>>, vector<1x64x32xbf16>
    %191 = vector.shape_cast %190 : vector<1x64x32xbf16> to vector<64x32xbf16>
    %cst_110 = arith.constant dense<0.000000e+00> : vector<16x32xf32>
    %192 = tpu.matmul %189, %191, %cst_110 {dimension_numbers = #tpu.dot_dimension_numbers<[1], [0], [0], [1], [0, 0, 1, 1], [], []>} : vector<16x64xbf16>, vector<64x32xbf16>, vector<16x32xf32> -> vector<16x32xf32>
    %c0_111 = arith.constant 0 : index
    %c0_112 = arith.constant 0 : index
    %c0_113 = arith.constant 0 : index
    %193 = vector.load %arg21[%c0_111, %c0_112, %c0_113] : memref<2x1x32xf32, #tpu.memory_space<vmem>>, vector<1x1x32xf32>
    %194 = vector.shape_cast %193 : vector<1x1x32xf32> to vector<1x32xf32>
    %195 = vector.broadcast %194 : vector<1x32xf32> to vector<16x32xf32>
    %196 = arith.addf %192, %195 : vector<16x32xf32>
    %197 = arith.addf %196, %178 : vector<16x32xf32>
    %c0_114 = arith.constant 0 : index
    %c0_115 = arith.constant 0 : index
    %c0_116 = arith.constant 0 : index
    %198 = vector.load %arg22[%c0_114, %c0_115, %c0_116] : memref<2x1x32xf32, #tpu.memory_space<vmem>>, vector<1x1x32xf32>
    %199 = vector.shape_cast %198 : vector<1x1x32xf32> to vector<1x32xf32>
    %c0_117 = arith.constant 0 : index
    %c0_118 = arith.constant 0 : index
    %c0_119 = arith.constant 0 : index
    %200 = vector.load %arg23[%c0_117, %c0_118, %c0_119] : memref<2x1x32xf32, #tpu.memory_space<vmem>>, vector<1x1x32xf32>
    %201 = vector.shape_cast %200 : vector<1x1x32xf32> to vector<1x32xf32>
    %cst_120 = arith.constant dense<0.000000e+00> : vector<16xf32>
    %202 = vector.multi_reduction <add>, %197, %cst_120 [1] : vector<16x32xf32> to vector<16xf32>
    %203 = vector.shape_cast %202 : vector<16xf32> to vector<16x1xf32>
    %cst_121 = arith.constant 3.200000e+01 : f32
    %204 = vector.broadcast %cst_121 : f32 to vector<16x1xf32>
    %205 = arith.divf %203, %204 : vector<16x1xf32>
    %206 = vector.broadcast %205 : vector<16x1xf32> to vector<16x32xf32>
    %207 = arith.subf %197, %206 : vector<16x32xf32>
    %208 = arith.mulf %207, %207 : vector<16x32xf32>
    %cst_122 = arith.constant dense<0.000000e+00> : vector<16xf32>
    %209 = vector.multi_reduction <add>, %208, %cst_122 [1] : vector<16x32xf32> to vector<16xf32>
    %210 = vector.shape_cast %209 : vector<16xf32> to vector<16x1xf32>
    %cst_123 = arith.constant 3.200000e+01 : f32
    %211 = vector.broadcast %cst_123 : f32 to vector<16x1xf32>
    %212 = arith.divf %210, %211 : vector<16x1xf32>
    %213 = vector.broadcast %205 : vector<16x1xf32> to vector<16x32xf32>
    %214 = arith.subf %197, %213 : vector<16x32xf32>
    %cst_124 = arith.constant 9.99999997E-7 : f32
    %215 = vector.broadcast %cst_124 : f32 to vector<16x1xf32>
    %216 = arith.addf %212, %215 : vector<16x1xf32>
    %217 = math.rsqrt %216 : vector<16x1xf32>
    %218 = vector.broadcast %217 : vector<16x1xf32> to vector<16x32xf32>
    %219 = arith.mulf %214, %218 : vector<16x32xf32>
    %220 = vector.broadcast %199 : vector<1x32xf32> to vector<16x32xf32>
    %221 = arith.mulf %219, %220 : vector<16x32xf32>
    %222 = vector.broadcast %201 : vector<1x32xf32> to vector<16x32xf32>
    %223 = arith.addf %221, %222 : vector<16x32xf32>
    %224 = arith.truncf %223 : vector<16x32xf32> to vector<16x32xbf16>
    %225 = tpu.transpose %223, [1, 0] : vector<16x32xf32> -> vector<32x16xf32>
    %226 = arith.truncf %225 : vector<32x16xf32> to vector<32x16xbf16>
    %cst_125 = arith.constant 0.000000e+00 : f32
    %227 = vector.broadcast %cst_125 : f32 to vector<16x32xf32>
    %c1_126 = arith.constant 1 : index
    %c0_127 = arith.constant 0 : index
    %c0_128 = arith.constant 0 : index
    %c0_129 = arith.constant 0 : index
    %228 = vector.load %arg12[%c1_126, %c0_127, %c0_128, %c0_129] : memref<2x2x32x16xbf16, #tpu.memory_space<vmem>>, vector<1x1x32x16xbf16>
    %229 = vector.shape_cast %228 : vector<1x1x32x16xbf16> to vector<32x16xbf16>
    %cst_130 = arith.constant dense<0.000000e+00> : vector<16x16xf32>
    %230 = tpu.matmul %224, %229, %cst_130 {dimension_numbers = #tpu.dot_dimension_numbers<[1], [0], [0], [1], [0, 0, 1, 1], [], []>} : vector<16x32xbf16>, vector<32x16xbf16>, vector<16x16xf32> -> vector<16x16xf32>
    %c1_131 = arith.constant 1 : index
    %c0_132 = arith.constant 0 : index
    %c0_133 = arith.constant 0 : index
    %c0_134 = arith.constant 0 : index
    %231 = vector.load %arg13[%c1_131, %c0_132, %c0_133, %c0_134] : memref<2x2x16x32xbf16, #tpu.memory_space<vmem>>, vector<1x1x16x32xbf16>
    %232 = vector.shape_cast %231 : vector<1x1x16x32xbf16> to vector<16x32xbf16>
    %cst_135 = arith.constant dense<0.000000e+00> : vector<16x16xf32>
    %233 = tpu.matmul %232, %226, %cst_135 {dimension_numbers = #tpu.dot_dimension_numbers<[1], [0], [0], [1], [0, 0, 1, 1], [], []>} : vector<16x32xbf16>, vector<32x16xbf16>, vector<16x16xf32> -> vector<16x16xf32>
    %c1_136 = arith.constant 1 : index
    %c0_137 = arith.constant 0 : index
    %c0_138 = arith.constant 0 : index
    %c0_139 = arith.constant 0 : index
    %234 = vector.load %arg14[%c1_136, %c0_137, %c0_138, %c0_139] : memref<2x2x32x16xbf16, #tpu.memory_space<vmem>>, vector<1x1x32x16xbf16>
    %235 = vector.shape_cast %234 : vector<1x1x32x16xbf16> to vector<32x16xbf16>
    %cst_140 = arith.constant dense<0.000000e+00> : vector<16x16xf32>
    %236 = tpu.matmul %224, %235, %cst_140 {dimension_numbers = #tpu.dot_dimension_numbers<[1], [0], [0], [1], [0, 0, 1, 1], [], []>} : vector<16x32xbf16>, vector<32x16xbf16>, vector<16x16xf32> -> vector<16x16xf32>
    %237 = arith.truncf %230 : vector<16x16xf32> to vector<16x16xbf16>
    %238 = arith.truncf %233 : vector<16x16xf32> to vector<16x16xbf16>
    %cst_141 = arith.constant dense<0.000000e+00> : vector<16x16xf32>
    %239 = tpu.matmul %237, %238, %cst_141 {dimension_numbers = #tpu.dot_dimension_numbers<[1], [0], [0], [1], [0, 0, 1, 1], [], []>} : vector<16x16xbf16>, vector<16x16xbf16>, vector<16x16xf32> -> vector<16x16xf32>
    %240 = arith.addf %239, %85 : vector<16x16xf32>
    %cst_142 = arith.constant dense<0xFF800000> : vector<16xf32>
    %241 = vector.multi_reduction <maximumf>, %240, %cst_142 [1] : vector<16x16xf32> to vector<16xf32>
    %242 = vector.shape_cast %241 : vector<16xf32> to vector<16x1xf32>
    %243 = vector.broadcast %242 : vector<16x1xf32> to vector<16x16xf32>
    %244 = arith.subf %240, %243 : vector<16x16xf32>
    %245 = math.exp %244 : vector<16x16xf32>
    %cst_143 = arith.constant dense<0.000000e+00> : vector<16xf32>
    %246 = vector.multi_reduction <add>, %245, %cst_143 [1] : vector<16x16xf32> to vector<16xf32>
    %247 = vector.shape_cast %246 : vector<16xf32> to vector<16x1xf32>
    %248 = tpu.reciprocal %247 {approx = true} : vector<16x1xf32> -> vector<16x1xf32>
    %249 = vector.broadcast %248 : vector<16x1xf32> to vector<16x16xf32>
    %250 = arith.mulf %245, %249 : vector<16x16xf32>
    %251 = arith.truncf %250 : vector<16x16xf32> to vector<16x16xbf16>
    %252 = arith.truncf %236 : vector<16x16xf32> to vector<16x16xbf16>
    %cst_144 = arith.constant dense<0.000000e+00> : vector<16x16xf32>
    %253 = tpu.matmul %251, %252, %cst_144 {dimension_numbers = #tpu.dot_dimension_numbers<[1], [0], [0], [1], [0, 0, 1, 1], [], []>} : vector<16x16xbf16>, vector<16x16xbf16>, vector<16x16xf32> -> vector<16x16xf32>
    %254 = arith.truncf %253 : vector<16x16xf32> to vector<16x16xbf16>
    %c1_145 = arith.constant 1 : index
    %c0_146 = arith.constant 0 : index
    %c0_147 = arith.constant 0 : index
    %c0_148 = arith.constant 0 : index
    %255 = vector.load %arg15[%c1_145, %c0_146, %c0_147, %c0_148] : memref<2x2x16x32xbf16, #tpu.memory_space<vmem>>, vector<1x1x16x32xbf16>
    %256 = vector.shape_cast %255 : vector<1x1x16x32xbf16> to vector<16x32xbf16>
    %cst_149 = arith.constant dense<0.000000e+00> : vector<16x32xf32>
    %257 = tpu.matmul %254, %256, %cst_149 {dimension_numbers = #tpu.dot_dimension_numbers<[1], [0], [0], [1], [0, 0, 1, 1], [], []>} : vector<16x16xbf16>, vector<16x32xbf16>, vector<16x32xf32> -> vector<16x32xf32>
    %258 = arith.addf %227, %257 : vector<16x32xf32>
    %c1_150 = arith.constant 1 : index
    %c1_151 = arith.constant 1 : index
    %c0_152 = arith.constant 0 : index
    %c0_153 = arith.constant 0 : index
    %259 = vector.load %arg12[%c1_150, %c1_151, %c0_152, %c0_153] : memref<2x2x32x16xbf16, #tpu.memory_space<vmem>>, vector<1x1x32x16xbf16>
    %260 = vector.shape_cast %259 : vector<1x1x32x16xbf16> to vector<32x16xbf16>
    %cst_154 = arith.constant dense<0.000000e+00> : vector<16x16xf32>
    %261 = tpu.matmul %224, %260, %cst_154 {dimension_numbers = #tpu.dot_dimension_numbers<[1], [0], [0], [1], [0, 0, 1, 1], [], []>} : vector<16x32xbf16>, vector<32x16xbf16>, vector<16x16xf32> -> vector<16x16xf32>
    %c1_155 = arith.constant 1 : index
    %c1_156 = arith.constant 1 : index
    %c0_157 = arith.constant 0 : index
    %c0_158 = arith.constant 0 : index
    %262 = vector.load %arg13[%c1_155, %c1_156, %c0_157, %c0_158] : memref<2x2x16x32xbf16, #tpu.memory_space<vmem>>, vector<1x1x16x32xbf16>
    %263 = vector.shape_cast %262 : vector<1x1x16x32xbf16> to vector<16x32xbf16>
    %cst_159 = arith.constant dense<0.000000e+00> : vector<16x16xf32>
    %264 = tpu.matmul %263, %226, %cst_159 {dimension_numbers = #tpu.dot_dimension_numbers<[1], [0], [0], [1], [0, 0, 1, 1], [], []>} : vector<16x32xbf16>, vector<32x16xbf16>, vector<16x16xf32> -> vector<16x16xf32>
    %c1_160 = arith.constant 1 : index
    %c1_161 = arith.constant 1 : index
    %c0_162 = arith.constant 0 : index
    %c0_163 = arith.constant 0 : index
    %265 = vector.load %arg14[%c1_160, %c1_161, %c0_162, %c0_163] : memref<2x2x32x16xbf16, #tpu.memory_space<vmem>>, vector<1x1x32x16xbf16>
    %266 = vector.shape_cast %265 : vector<1x1x32x16xbf16> to vector<32x16xbf16>
    %cst_164 = arith.constant dense<0.000000e+00> : vector<16x16xf32>
    %267 = tpu.matmul %224, %266, %cst_164 {dimension_numbers = #tpu.dot_dimension_numbers<[1], [0], [0], [1], [0, 0, 1, 1], [], []>} : vector<16x32xbf16>, vector<32x16xbf16>, vector<16x16xf32> -> vector<16x16xf32>
    %268 = arith.truncf %261 : vector<16x16xf32> to vector<16x16xbf16>
    %269 = arith.truncf %264 : vector<16x16xf32> to vector<16x16xbf16>
    %cst_165 = arith.constant dense<0.000000e+00> : vector<16x16xf32>
    %270 = tpu.matmul %268, %269, %cst_165 {dimension_numbers = #tpu.dot_dimension_numbers<[1], [0], [0], [1], [0, 0, 1, 1], [], []>} : vector<16x16xbf16>, vector<16x16xbf16>, vector<16x16xf32> -> vector<16x16xf32>
    %271 = arith.addf %270, %85 : vector<16x16xf32>
    %cst_166 = arith.constant dense<0xFF800000> : vector<16xf32>
    %272 = vector.multi_reduction <maximumf>, %271, %cst_166 [1] : vector<16x16xf32> to vector<16xf32>
    %273 = vector.shape_cast %272 : vector<16xf32> to vector<16x1xf32>
    %274 = vector.broadcast %273 : vector<16x1xf32> to vector<16x16xf32>
    %275 = arith.subf %271, %274 : vector<16x16xf32>
    %276 = math.exp %275 : vector<16x16xf32>
    %cst_167 = arith.constant dense<0.000000e+00> : vector<16xf32>
    %277 = vector.multi_reduction <add>, %276, %cst_167 [1] : vector<16x16xf32> to vector<16xf32>
    %278 = vector.shape_cast %277 : vector<16xf32> to vector<16x1xf32>
    %279 = tpu.reciprocal %278 {approx = true} : vector<16x1xf32> -> vector<16x1xf32>
    %280 = vector.broadcast %279 : vector<16x1xf32> to vector<16x16xf32>
    %281 = arith.mulf %276, %280 : vector<16x16xf32>
    %282 = arith.truncf %281 : vector<16x16xf32> to vector<16x16xbf16>
    %283 = arith.truncf %267 : vector<16x16xf32> to vector<16x16xbf16>
    %cst_168 = arith.constant dense<0.000000e+00> : vector<16x16xf32>
    %284 = tpu.matmul %282, %283, %cst_168 {dimension_numbers = #tpu.dot_dimension_numbers<[1], [0], [0], [1], [0, 0, 1, 1], [], []>} : vector<16x16xbf16>, vector<16x16xbf16>, vector<16x16xf32> -> vector<16x16xf32>
    %285 = arith.truncf %284 : vector<16x16xf32> to vector<16x16xbf16>
    %c1_169 = arith.constant 1 : index
    %c1_170 = arith.constant 1 : index
    %c0_171 = arith.constant 0 : index
    %c0_172 = arith.constant 0 : index
    %286 = vector.load %arg15[%c1_169, %c1_170, %c0_171, %c0_172] : memref<2x2x16x32xbf16, #tpu.memory_space<vmem>>, vector<1x1x16x32xbf16>
    %287 = vector.shape_cast %286 : vector<1x1x16x32xbf16> to vector<16x32xbf16>
    %cst_173 = arith.constant dense<0.000000e+00> : vector<16x32xf32>
    %288 = tpu.matmul %285, %287, %cst_173 {dimension_numbers = #tpu.dot_dimension_numbers<[1], [0], [0], [1], [0, 0, 1, 1], [], []>} : vector<16x16xbf16>, vector<16x32xbf16>, vector<16x32xf32> -> vector<16x32xf32>
    %289 = arith.addf %258, %288 : vector<16x32xf32>
    %290 = arith.addf %289, %223 : vector<16x32xf32>
    %c1_174 = arith.constant 1 : index
    %c0_175 = arith.constant 0 : index
    %c0_176 = arith.constant 0 : index
    %291 = vector.load %arg16[%c1_174, %c0_175, %c0_176] : memref<2x1x32xf32, #tpu.memory_space<vmem>>, vector<1x1x32xf32>
    %292 = vector.shape_cast %291 : vector<1x1x32xf32> to vector<1x32xf32>
    %c1_177 = arith.constant 1 : index
    %c0_178 = arith.constant 0 : index
    %c0_179 = arith.constant 0 : index
    %293 = vector.load %arg17[%c1_177, %c0_178, %c0_179] : memref<2x1x32xf32, #tpu.memory_space<vmem>>, vector<1x1x32xf32>
    %294 = vector.shape_cast %293 : vector<1x1x32xf32> to vector<1x32xf32>
    %cst_180 = arith.constant dense<0.000000e+00> : vector<16xf32>
    %295 = vector.multi_reduction <add>, %290, %cst_180 [1] : vector<16x32xf32> to vector<16xf32>
    %296 = vector.shape_cast %295 : vector<16xf32> to vector<16x1xf32>
    %cst_181 = arith.constant 3.200000e+01 : f32
    %297 = vector.broadcast %cst_181 : f32 to vector<16x1xf32>
    %298 = arith.divf %296, %297 : vector<16x1xf32>
    %299 = vector.broadcast %298 : vector<16x1xf32> to vector<16x32xf32>
    %300 = arith.subf %290, %299 : vector<16x32xf32>
    %301 = arith.mulf %300, %300 : vector<16x32xf32>
    %cst_182 = arith.constant dense<0.000000e+00> : vector<16xf32>
    %302 = vector.multi_reduction <add>, %301, %cst_182 [1] : vector<16x32xf32> to vector<16xf32>
    %303 = vector.shape_cast %302 : vector<16xf32> to vector<16x1xf32>
    %cst_183 = arith.constant 3.200000e+01 : f32
    %304 = vector.broadcast %cst_183 : f32 to vector<16x1xf32>
    %305 = arith.divf %303, %304 : vector<16x1xf32>
    %306 = vector.broadcast %298 : vector<16x1xf32> to vector<16x32xf32>
    %307 = arith.subf %290, %306 : vector<16x32xf32>
    %cst_184 = arith.constant 9.99999997E-7 : f32
    %308 = vector.broadcast %cst_184 : f32 to vector<16x1xf32>
    %309 = arith.addf %305, %308 : vector<16x1xf32>
    %310 = math.rsqrt %309 : vector<16x1xf32>
    %311 = vector.broadcast %310 : vector<16x1xf32> to vector<16x32xf32>
    %312 = arith.mulf %307, %311 : vector<16x32xf32>
    %313 = vector.broadcast %292 : vector<1x32xf32> to vector<16x32xf32>
    %314 = arith.mulf %312, %313 : vector<16x32xf32>
    %315 = vector.broadcast %294 : vector<1x32xf32> to vector<16x32xf32>
    %316 = arith.addf %314, %315 : vector<16x32xf32>
    %317 = arith.truncf %316 : vector<16x32xf32> to vector<16x32xbf16>
    %c1_185 = arith.constant 1 : index
    %c0_186 = arith.constant 0 : index
    %c0_187 = arith.constant 0 : index
    %318 = vector.load %arg18[%c1_185, %c0_186, %c0_187] : memref<2x32x64xbf16, #tpu.memory_space<vmem>>, vector<1x32x64xbf16>
    %319 = vector.shape_cast %318 : vector<1x32x64xbf16> to vector<32x64xbf16>
    %cst_188 = arith.constant dense<0.000000e+00> : vector<16x64xf32>
    %320 = tpu.matmul %317, %319, %cst_188 {dimension_numbers = #tpu.dot_dimension_numbers<[1], [0], [0], [1], [0, 0, 1, 1], [], []>} : vector<16x32xbf16>, vector<32x64xbf16>, vector<16x64xf32> -> vector<16x64xf32>
    %c1_189 = arith.constant 1 : index
    %c0_190 = arith.constant 0 : index
    %c0_191 = arith.constant 0 : index
    %321 = vector.load %arg19[%c1_189, %c0_190, %c0_191] : memref<2x1x64xf32, #tpu.memory_space<vmem>>, vector<1x1x64xf32>
    %322 = vector.shape_cast %321 : vector<1x1x64xf32> to vector<1x64xf32>
    %323 = vector.broadcast %322 : vector<1x64xf32> to vector<16x64xf32>
    %324 = arith.addf %320, %323 : vector<16x64xf32>
    %cst_192 = arith.constant 0.000000e+00 : f32
    %325 = vector.broadcast %cst_192 : f32 to vector<16x64xf32>
    %326 = arith.maximumf %324, %325 : vector<16x64xf32>
    %327 = arith.truncf %326 : vector<16x64xf32> to vector<16x64xbf16>
    %c1_193 = arith.constant 1 : index
    %c0_194 = arith.constant 0 : index
    %c0_195 = arith.constant 0 : index
    %328 = vector.load %arg20[%c1_193, %c0_194, %c0_195] : memref<2x64x32xbf16, #tpu.memory_space<vmem>>, vector<1x64x32xbf16>
    %329 = vector.shape_cast %328 : vector<1x64x32xbf16> to vector<64x32xbf16>
    %cst_196 = arith.constant dense<0.000000e+00> : vector<16x32xf32>
    %330 = tpu.matmul %327, %329, %cst_196 {dimension_numbers = #tpu.dot_dimension_numbers<[1], [0], [0], [1], [0, 0, 1, 1], [], []>} : vector<16x64xbf16>, vector<64x32xbf16>, vector<16x32xf32> -> vector<16x32xf32>
    %c1_197 = arith.constant 1 : index
    %c0_198 = arith.constant 0 : index
    %c0_199 = arith.constant 0 : index
    %331 = vector.load %arg21[%c1_197, %c0_198, %c0_199] : memref<2x1x32xf32, #tpu.memory_space<vmem>>, vector<1x1x32xf32>
    %332 = vector.shape_cast %331 : vector<1x1x32xf32> to vector<1x32xf32>
    %333 = vector.broadcast %332 : vector<1x32xf32> to vector<16x32xf32>
    %334 = arith.addf %330, %333 : vector<16x32xf32>
    %335 = arith.addf %334, %316 : vector<16x32xf32>
    %c1_200 = arith.constant 1 : index
    %c0_201 = arith.constant 0 : index
    %c0_202 = arith.constant 0 : index
    %336 = vector.load %arg22[%c1_200, %c0_201, %c0_202] : memref<2x1x32xf32, #tpu.memory_space<vmem>>, vector<1x1x32xf32>
    %337 = vector.shape_cast %336 : vector<1x1x32xf32> to vector<1x32xf32>
    %c1_203 = arith.constant 1 : index
    %c0_204 = arith.constant 0 : index
    %c0_205 = arith.constant 0 : index
    %338 = vector.load %arg23[%c1_203, %c0_204, %c0_205] : memref<2x1x32xf32, #tpu.memory_space<vmem>>, vector<1x1x32xf32>
    %339 = vector.shape_cast %338 : vector<1x1x32xf32> to vector<1x32xf32>
    %cst_206 = arith.constant dense<0.000000e+00> : vector<16xf32>
    %340 = vector.multi_reduction <add>, %335, %cst_206 [1] : vector<16x32xf32> to vector<16xf32>
    %341 = vector.shape_cast %340 : vector<16xf32> to vector<16x1xf32>
    %cst_207 = arith.constant 3.200000e+01 : f32
    %342 = vector.broadcast %cst_207 : f32 to vector<16x1xf32>
    %343 = arith.divf %341, %342 : vector<16x1xf32>
    %344 = vector.broadcast %343 : vector<16x1xf32> to vector<16x32xf32>
    %345 = arith.subf %335, %344 : vector<16x32xf32>
    %346 = arith.mulf %345, %345 : vector<16x32xf32>
    %cst_208 = arith.constant dense<0.000000e+00> : vector<16xf32>
    %347 = vector.multi_reduction <add>, %346, %cst_208 [1] : vector<16x32xf32> to vector<16xf32>
    %348 = vector.shape_cast %347 : vector<16xf32> to vector<16x1xf32>
    %cst_209 = arith.constant 3.200000e+01 : f32
    %349 = vector.broadcast %cst_209 : f32 to vector<16x1xf32>
    %350 = arith.divf %348, %349 : vector<16x1xf32>
    %351 = vector.broadcast %343 : vector<16x1xf32> to vector<16x32xf32>
    %352 = arith.subf %335, %351 : vector<16x32xf32>
    %cst_210 = arith.constant 9.99999997E-7 : f32
    %353 = vector.broadcast %cst_210 : f32 to vector<16x1xf32>
    %354 = arith.addf %350, %353 : vector<16x1xf32>
    %355 = math.rsqrt %354 : vector<16x1xf32>
    %356 = vector.broadcast %355 : vector<16x1xf32> to vector<16x32xf32>
    %357 = arith.mulf %352, %356 : vector<16x32xf32>
    %358 = vector.broadcast %337 : vector<1x32xf32> to vector<16x32xf32>
    %359 = arith.mulf %357, %358 : vector<16x32xf32>
    %360 = vector.broadcast %339 : vector<1x32xf32> to vector<16x32xf32>
    %361 = arith.addf %359, %360 : vector<16x32xf32>
    %362 = arith.truncf %361 : vector<16x32xf32> to vector<16x32xbf16>
    %c0_211 = arith.constant 0 : index
    %c0_212 = arith.constant 0 : index
    %363 = vector.load %arg24[%c0_211, %c0_212] : memref<32x32xbf16, #tpu.memory_space<vmem>>, vector<32x32xbf16>
    %cst_213 = arith.constant dense<0.000000e+00> : vector<16x32xf32>
    %364 = tpu.matmul %362, %363, %cst_213 {dimension_numbers = #tpu.dot_dimension_numbers<[1], [0], [0], [1], [0, 0, 1, 1], [], []>} : vector<16x32xbf16>, vector<32x32xbf16>, vector<16x32xf32> -> vector<16x32xf32>
    %c0_214 = arith.constant 0 : index
    %c0_215 = arith.constant 0 : index
    %365 = vector.load %arg25[%c0_214, %c0_215] : memref<1x32xf32, #tpu.memory_space<vmem>>, vector<1x32xf32>
    %366 = vector.broadcast %365 : vector<1x32xf32> to vector<16x32xf32>
    %367 = arith.addf %364, %366 : vector<16x32xf32>
    %c0_216 = arith.constant 0 : index
    %c0_217 = arith.constant 0 : index
    %368 = vector.load %arg26[%c0_216, %c0_217] : memref<16x32xf32, #tpu.memory_space<vmem>>, vector<16x32xf32>
    tpu.vector_store %arg26[%c0_216, %c0_217], %367 {strides = array<i32>} : memref<16x32xf32, #tpu.memory_space<vmem>>, vector<16x32xf32>,
    return
  }
}

</mosaic_0001>

<bundles_post_ra>
// kernel: stochastic_transformer_forward.1
= control target key start
LH: loop header
LB: loop body
LE: loop exit
PB: predicated region body
PF: predicated region fallthrough
CT: control target
= control target key end

     0   :  { %s3543_s0 = inlined_call_operand.vmem [shape: bf16[16,32], index: 0, kind: input, shape index: {}]   ;;  %s3544_s1 = inlined_call_operand.vmem [shape: f32[16,32], index: 1, kind: input, shape index: {}]   ;;  %s3545_s2 = inlined_call_operand.vmem [shape: f32[16,32], index: 2, kind: input, shape index: {}]   ;;  %s3546_s3 = inlined_call_operand.vmem [shape: f32[16,16], index: 3, kind: input, shape index: {}]   ;;  %s3547_s4 = inlined_call_operand.vmem [shape: bf16[32,32], index: 4, kind: input, shape index: {}]   ;;  %s3548_s5 = inlined_call_operand.vmem [shape: f32[1,32], index: 5, kind: input, shape index: {}]   ;;  %s3549_s6 = inlined_call_operand.vmem [shape: f32[1,32], index: 6, kind: input, shape index: {}]   ;;  %s3550_s7 = inlined_call_operand.vmem [shape: bf16[32,32], index: 7, kind: input, shape index: {}]   ;;  %s3551_s8 = inlined_call_operand.vmem [shape: f32[1,32], index: 8, kind: input, shape index: {}]   ;;  %s3552_s9 = inlined_call_operand.vmem [shape: f32[1,32], index: 9, kind: input, shape index: {}]   ;;  %s3553_s10 = inlined_call_operand.vmem [shape: f32[1,32], index: 10, kind: input, shape index: {}]   ;;  %s3554_s11 = inlined_call_operand.vmem [shape: f32[1,32], index: 11, kind: input, shape index: {}]   ;;  %s3555_s12 = inlined_call_operand.vmem [shape: bf16[2,2,32,16], index: 12, kind: input, shape index: {}]   ;;  %s3556_s13 = inlined_call_operand.vmem [shape: bf16[2,2,16,32], index: 13, kind: input, shape index: {}]   ;;  %s3557_s14 = inlined_call_operand.vmem [shape: bf16[2,2,32,16], index: 14, kind: input, shape index: {}]   ;;  %s3558_s15 = inlined_call_operand.vmem [shape: bf16[2,2,16,32], index: 15, kind: input, shape index: {}]   ;;  %s3559_s16 = inlined_call_operand.vmem [shape: f32[2,1,32], index: 16, kind: input, shape index: {}]   ;;  %s3560_s17 = inlined_call_operand.vmem [shape: f32[2,1,32], index: 17, kind: input, shape index: {}]   ;;  %s3561_s18 = inlined_call_operand.vmem [shape: bf16[2,32,64], index: 18, kind: input, shape index: {}]   ;;  %s3562_s19 = inlined_call_operand.vmem [shape: f32[2,1,64], index: 19, kind: input, shape index: {}]   ;;  %s3563_s20 = inlined_call_operand.vmem [shape: bf16[2,64,32], index: 20, kind: input, shape index: {}]   ;;  %s3564_s21 = inlined_call_operand.vmem [shape: f32[2,1,32], index: 21, kind: input, shape index: {}]   ;;  %s3565_s22 = inlined_call_operand.vmem [shape: f32[2,1,32], index: 22, kind: input, shape index: {}]   ;;  %s3566_s23 = inlined_call_operand.vmem [shape: f32[2,1,32], index: 23, kind: input, shape index: {}]   ;;  %s3567_s24 = inlined_call_operand.vmem [shape: bf16[32,32], index: 24, kind: input, shape index: {}]   ;;  %s3568_s25 = inlined_call_operand.vmem [shape: f32[1,32], index: 25, kind: input, shape index: {}]   ;;  %s3569_s26 = inlined_call_operand.hbm [shape: f32[16,32], index: 26, kind: output, shape index: {}]  }
   0x1   :  { %3575 = sst [smem:[#allocation5_spill]] %s3543_s0 }
   0x2   :  { %3576 = sst [smem:[#allocation6_spill]] %s3544_s1 }
   0x3   :  { %3577 = sst [smem:[#allocation7_spill]] %s3545_s2 }
   0x4   :  { %3578 = sst [smem:[#allocation8_spill]] %s3546_s3 }
   0x5   :  { %3579 = sst [smem:[#allocation9_spill]] %s3547_s4 }
   0x6   :  { %3580 = sst [smem:[#allocation10_spill]] %s3548_s5 }
   0x7   :  { %3581 = sst [smem:[#allocation11_spill]] %s3549_s6 }
   0x8   :  { %3582 = sst [smem:[#allocation12_spill]] %s3550_s7 }
   0x9   :  { %3583 = sst [smem:[#allocation13_spill]] %s3551_s8 }
   0xa   :  { %3584 = sst [smem:[#allocation14_spill]] %s3552_s9 }
   0xb   :  { %3585 = sst [smem:[#allocation15_spill]] %s3553_s10 }
   0xc   :  { %s3586_s7 = sld [smem:[#allocation9_spill]]  ;;  %v2955_v1 = vmov 0.0   ;;  %vm2956_vm0 = vmmov 0   ;;  %vm110_vm1 = vcmask 261120  }
   0xd   :  { %2593 = vmatprep.subr.bf16.mxu0 %v2955_v1  ;;  %2601 = vmatprep.subr.bf16.mxu1 %v2955_v1  ;;  %s3587_s0 = sld [smem:[#allocation5_spill]] }
   0xe   :  { %2597 = vmatprep.mubr.msk.bf16.mxu0 %vm2956_vm0, %v2955_v1  ;;  %2605 = vmatprep.mubr.msk.bf16.mxu1 %vm2956_vm0, %v2955_v1 }
  0x12   :  { %v2830_v0 = vld [vmem:[%s3586_s7 + $0x8] sm:$0xff]   ;;  %v2831_v2 = vld [vmem:[%s3586_s7] sm:$0xff]  }
  0x13   :  { %2594 = vmatpush3.bf16.msra.mxu0 %v2830_v0  ;;  %v2832_v3 = vld [vmem:[%s3587_s0] sm:$0xff]  }
  0x14   :  { %2595 = vmatprep.subr.bf16.mxu0 %v2955_v1 }
  0x17   :  { %2596 = vmatpush3.bf16.msra.mxu0 %v2831_v2 }
  0x18   :  { %2609 = vmatprep.subr.bf16.mxu0 %v2955_v1 }
  0x1a   :  { %2598 = vmatmul.mubr.msk.bf16.vlgmr.msra.gmra.mxu0 %vm110_vm1, %v2832_v3 }
  0x1b   :  { %2613 = vmatprep.mubr.msk.bf16.mxu0 %vm2956_vm0, %v2955_v1 }
  0x1c   :  { %31 = vsyncpa [#allocation3], 0  ;;  %s3588_s2 = sld [smem:[#allocation6_spill]]  ;;  %vm562_vm2 = vcmask 130048   ;;  %vm1220_vm3 = vcmask 523264  }
  0x1d   :  { %s3589_s27 = sld [smem:[#allocation12_spill]] }
  0x1e   :  { %s3590_s4 = sld [smem:[#allocation10_spill]] }
  0x1f   :  { %s3591_s9 = sld [smem:[#allocation11_spill]] }
  0x20   :  { %s3592_s5 = sld [smem:[#allocation13_spill]] }
  0x21   :  { %s3593_s1 = sld [smem:[#allocation14_spill]] }
  0x22   :  { %v91_v4 = vld [vmem:[%s3588_s2] sm:$0xff]  ;;  %v92_v8 = vld [vmem:[%s3588_s2 + $0x8] sm:$0xff]  ;;  %s3594_s7 = sld [smem:[#allocation7_spill]] }
  0x23   :  { %v2833_v24 = vld [vmem:[%s3589_s27 + $0x8] sm:$0xff]   ;;  %v2834_v25 = vld [vmem:[%s3589_s27] sm:$0xff]  }
  0x24   :  { %2602 = vmatpush3.bf16.msra.mxu1 %v2833_v24  ;;  %v2365_v33 = vld [vmem:[%s3590_s4] ss:$0 sm:$0xff] }
  0x25   :  { %2603 = vmatprep.subr.bf16.mxu1 %v2955_v1  ;;  %v2366_v37 = vld [vmem:[%s3591_s9] ss:$0 sm:$0xff] }
  0x28   :  { %2604 = vmatpush3.bf16.msra.mxu1 %v2834_v25 }
  0x29   :  { %2617 = vmatprep.subr.bf16.mxu1 %v2955_v1 }
  0xda   :  { %v148_v5 = vpop.f32.mrf.mxu0 }
  0xdb   :  { %v149_v6 = vadd.f32 %v148_v5, %v91_v4  ;;  %v2370_v5 = vld [vmem:[%s3592_s5] ss:$0 sm:$0xff]  ;;  %s3595_s5 = sld [smem:[#allocation15_spill]] }
  0xdc   :  { %v2599_v7 = vpop.f32.mrf.mxu0 }
  0xdd   :  { %v157_v9 = vsel %vm110_vm1, %v149_v6, 0.0  ;;  %v2371_v7 = vld [vmem:[%s3593_s1] ss:$0 sm:$0xff]  ;;  %s3596_s1 = sld [smem:[#allocation8_spill]] }
  0xde   :  { %158 = vadd.xlane.f32.xlu0 %v157_v9  ;;  %v151_v10 = vpop.f32.mrf.mxu0 }
  0xdf   :  { %v152_v11 = vadd.f32 %v151_v10, %v92_v8  ;;  %v307_v10 = vld [vmem:[%s3594_s7] sm:$0xff] }
  0xe0   :  { %v2600_v12 = vpop.f32.mrf.mxu0 }
  0xe1   :  { %v160_v13 = vsel %vm110_vm1, %v152_v11, 0.0 }
  0xe2   :  { %161 = vadd.xlane.f32.xlu0 %v160_v13 }
 0x167   :  { %v159_v14 = vpop.xlane.xlu0 %158 }
 0x168   :  { %v164_v15 = vmul.f32 0.03125, %v159_v14 }
 0x16a   :  { %v166_v16 = vsub.f32 %v149_v6, %v164_v15  ;;  %v308_v15 = vld [vmem:[%s3594_s7 + $0x8] sm:$0xff] }
 0x16b   :  { %v162_v17 = vpop.xlane.xlu0 %161 }
 0x16c   :  { %v165_v18 = vmul.f32 0.03125, %v162_v17  ;;  %v168_v19 = vmul.f32 %v166_v16, %v166_v16 }
 0x16e   :  { %v167_v20 = vsub.f32 %v152_v11, %v165_v18  ;;  %v170_v21 = vsel %vm110_vm1, %v168_v19, 0.0 }
 0x16f   :  { %171 = vadd.xlane.f32.xlu1 %v170_v21 }
 0x170   :  { %v169_v22 = vmul.f32 %v167_v20, %v167_v20 }
 0x172   :  { %v173_v23 = vsel %vm110_vm1, %v169_v22, 0.0 }
 0x173   :  { %174 = vadd.xlane.f32.xlu1 %v173_v23 }
 0x1f8   :  { %v172_v26 = vpop.xlane.xlu1 %171 }
 0x1f9   :  { %v176_v27 = vmul.f32 0.03125, %v172_v26 }
 0x1fb   :  { %v178_v28 = vadd.f32 1e-05, %v176_v27 }
 0x1fc   :  { %v175_v29 = vpop.xlane.xlu1 %174 }
 0x1fd   :  { %2873 = vrsqrt.f32 %v178_v28  ;;  %v177_v30 = vmul.f32 0.03125, %v175_v29 }
 0x1ff   :  { %v179_v31 = vadd.f32 1e-05, %v177_v30  ;;  %v2835_v30 = vld [vmem:[%s3555_s12 + $0x8] sm:$0xff]  }
 0x200   :  { %2610 = vmatpush3.bf16.msra.mxu0 %v2835_v30 }
 0x201   :  { %2875 = vrsqrt.f32 %v179_v31  ;;  %2611 = vmatprep.subr.bf16.mxu0 %v2955_v1  ;;  %v2836_v31 = vld [vmem:[%s3555_s12] sm:$0xff]  }
 0x204   :  { %2612 = vmatpush3.bf16.msra.mxu0 %v2836_v31 }
 0x205   :  { %2625 = vmatprep.subr.bf16.mxu0 %v2955_v1 }
 0x20a   :  { %v2874_v32 = vpop.eup %2873 }
 0x20b   :  { %v182_v34 = vmul.f32 %v2874_v32, %v166_v16 }
 0x20d   :  { %v190_v35 = vmul.f32 %v2365_v33, %v182_v34 }
 0x20e   :  { %v2876_v36 = vpop.eup %2875 }
 0x20f   :  { %v183_v38 = vmul.f32 %v2876_v36, %v167_v20  ;;  %v198_v40 = vadd.f32 %v2366_v37, %v190_v35 }
 0x211   :  { %v191_v39 = vmul.f32 %v2365_v33, %v183_v38  ;;  %v200_v42 = vmax.f32 %v198_v40, 0.0 }
 0x213   :  { %v199_v41 = vadd.f32 %v2366_v37, %v191_v39  ;;  %v2372_v39 = vld [vmem:[%s3595_s5] ss:$0 sm:$0xff] }
 0x215   :  { %v201_v43 = vmax.f32 %v199_v41, 0.0  ;;  %v2373_v41 = vld [vmem:[%s3554_s11] ss:$0 sm:$0xff] }
 0x217   :  { %v202_v44 = vpack.c.bf16 %v201_v43, %v200_v42 }
 0x219   :  { %2606 = vmatmul.mubr.msk.bf16.vlgmr.msra.gmra.mxu1 %vm110_vm1, %v202_v44 }
 0x21a   :  { %2621 = vmatprep.mubr.msk.bf16.mxu1 %vm2956_vm0, %v2955_v1 }
 0x2d9   :  { %v256_v45 = vpop.f32.mrf.mxu1 }
 0x2da   :  { %v265_v46 = vsel %vm110_vm1, %v256_v45, 0.0 }
 0x2db   :  { %266 = vadd.xlane.f32.xlu0 %v265_v46  ;;  %v2607_v47 = vpop.f32.mrf.mxu1 }
 0x2dd   :  { %v259_v48 = vpop.f32.mrf.mxu1 }
 0x2de   :  { %v268_v49 = vsel %vm110_vm1, %v259_v48, 0.0 }
 0x2df   :  { %269 = vadd.xlane.f32.xlu1 %v268_v49  ;;  %v2608_v50 = vpop.f32.mrf.mxu1 }
 0x2e0   :  { %v2838_v50 = vld [vmem:[%s3557_s14] sm:$0xff]  }
 0x364   :  { %v267_v51 = vpop.xlane.xlu0 %266 }
 0x365   :  { %v271_v52 = vmul.f32 0.03125, %v267_v51 }
 0x367   :  { %v273_v53 = vsub.f32 %v256_v45, %v271_v52 }
 0x368   :  { %v270_v54 = vpop.xlane.xlu1 %269 }
 0x369   :  { %v272_v55 = vmul.f32 0.03125, %v270_v54  ;;  %v275_v56 = vmul.f32 %v273_v53, %v273_v53 }
 0x36b   :  { %v274_v57 = vsub.f32 %v259_v48, %v272_v55  ;;  %v277_v58 = vsel %vm110_vm1, %v275_v56, 0.0  ;;  %v2837_v48 = vld [vmem:[%s3557_s14 + $0x8] sm:$0xff]  }
 0x36c   :  { %278 = vadd.xlane.f32.xlu0 %v277_v58 }
 0x36d   :  { %v276_v59 = vmul.f32 %v274_v57, %v274_v57 }
 0x36f   :  { %v280_v60 = vsel %vm110_vm1, %v276_v59, 0.0 }
 0x370   :  { %281 = vadd.xlane.f32.xlu1 %v280_v60 }
 0x3f5   :  { %v279_v61 = vpop.xlane.xlu0 %278 }
 0x3f6   :  { %v283_v62 = vmul.f32 0.03125, %v279_v61 }
 0x3f8   :  { %v285_v63 = vadd.f32 1e-05, %v283_v62 }
 0x3f9   :  { %v282_v0 = vpop.xlane.xlu1 %281 }
 0x3fa   :  { %2877 = vrsqrt.f32 %v285_v63  ;;  %v284_v2 = vmul.f32 0.03125, %v282_v0 }
 0x3fc   :  { %v286_v3 = vadd.f32 1e-05, %v284_v2 }
 0x3fe   :  { %2879 = vrsqrt.f32 %v286_v3 }
 0x407   :  { %v2878_v4 = vpop.eup %2877 }
 0x408   :  { %v289_v6 = vmul.f32 %v2878_v4, %v273_v53 }
 0x40a   :  { %v297_v8 = vmul.f32 %v2370_v5, %v289_v6 }
 0x40b   :  { %v2880_v9 = vpop.eup %2879 }
 0x40c   :  { %v305_v11 = vadd.f32 %v2371_v7, %v297_v8  ;;  %v290_v12 = vmul.f32 %v2880_v9, %v274_v57  ;;  %v2839_v57 = vld [vmem:[%s3556_s13] sm:$0xff]  }
 0x40e   :  { %v309_v13 = vadd.f32 %v307_v10, %v305_v11  ;;  %v298_v14 = vmul.f32 %v2370_v5, %v290_v12  ;;  %v2840_v10 = vld [vmem:[%s3555_s12 + $0x18] sm:$0xff]   ;;  %v2841_v11 = vld [vmem:[%s3555_s12 + $0x10] sm:$0xff]  }
 0x40f   :  { %v2842_v12 = vld [vmem:[%s3557_s14 + $0x18] sm:$0xff]  }
 0x410   :  { %v313_v16 = vsel %vm110_vm1, %v309_v13, 0.0  ;;  %v306_v17 = vadd.f32 %v2371_v7, %v298_v14  ;;  %v3242_v14 = vld [vmem:[%s3596_s1] sm:$0xff] }
 0x411   :  { %314 = vadd.xlane.f32.xlu0 %v313_v16 }
 0x412   :  { %v310_v18 = vadd.f32 %v308_v15, %v306_v17 }
 0x414   :  { %v316_v19 = vsel %vm110_vm1, %v310_v18, 0.0 }
 0x415   :  { %317 = vadd.xlane.f32.xlu1 %v316_v19 }
 0x49a   :  { %v315_v20 = vpop.xlane.xlu0 %314 }
 0x49b   :  { %v319_v21 = vmul.f32 0.03125, %v315_v20 }
 0x49d   :  { %v321_v22 = vsub.f32 %v309_v13, %v319_v21  ;;  %v2843_v13 = vld [vmem:[%s3557_s14 + $0x10] sm:$0xff]  }
 0x49e   :  { %v318_v23 = vpop.xlane.xlu1 %317 }
 0x49f   :  { %v320_v24 = vmul.f32 0.03125, %v318_v23  ;;  %v323_v25 = vmul.f32 %v321_v22, %v321_v22 }
 0x4a1   :  { %v322_v26 = vsub.f32 %v310_v18, %v320_v24  ;;  %v325_v27 = vsel %vm110_vm1, %v323_v25, 0.0  ;;  %v3248_v18 = vld [vmem:[%s3596_s1 + $0x8] sm:$0xff] }
 0x4a2   :  { %326 = vadd.xlane.f32.xlu0 %v325_v27 }
 0x4a3   :  { %v324_v28 = vmul.f32 %v322_v26, %v322_v26 }
 0x4a5   :  { %v328_v29 = vsel %vm110_vm1, %v324_v28, 0.0 }
 0x4a6   :  { %329 = vadd.xlane.f32.xlu1 %v328_v29 }
 0x52b   :  { %v327_v32 = vpop.xlane.xlu0 %326 }
 0x52c   :  { %v331_v33 = vmul.f32 0.03125, %v327_v32 }
 0x52e   :  { %v333_v34 = vadd.f32 1e-06, %v331_v33 }
 0x52f   :  { %v330_v35 = vpop.xlane.xlu1 %329 }
 0x530   :  { %2881 = vrsqrt.f32 %v333_v34  ;;  %v332_v36 = vmul.f32 0.03125, %v330_v35 }
 0x532   :  { %v334_v37 = vadd.f32 1e-06, %v332_v36 }
 0x534   :  { %2883 = vrsqrt.f32 %v334_v37 }
 0x53d   :  { %v2882_v38 = vpop.eup %2881 }
 0x53e   :  { %v337_v40 = vmul.f32 %v2882_v38, %v321_v22 }
 0x540   :  { %v345_v42 = vmul.f32 %v2372_v39, %v337_v40 }
 0x541   :  { %v2884_v43 = vpop.eup %2883 }
 0x542   :  { %v3176_v44 = vadd.f32 %v2373_v41, %v345_v42  ;;  %v338_v45 = vmul.f32 %v2884_v43, %v322_v26 }
 0x544   :  { %358 = vxpose.xlu0.b32.start [1/2] (short) (narrow) %v3176_v44, 32  ;;  %v346_v46 = vmul.f32 %v2372_v39, %v338_v45 }
 0x546   :  { %v3179_v47 = vadd.f32 %v2373_v41, %v346_v46 }
 0x548   :  { %359 = vxpose.xlu0.b32.end [2/2] (short) (narrow) %v3179_v47, 32  ;;  %v357_v49 = vpack.c.bf16 %v3179_v47, %v3176_v44 }
 0x54a   :  { %2614 = vmatmul.mubr.msk.bf16.vlgmr.msra.gmra.mxu0 %vm110_vm1, %v357_v49 }
 0x54b   :  { %2626 = vmatpush3.bf16.msra.mxu0 %v2837_v48  ;;  %2629 = vmatprep.mubr.msk.bf16.mxu0 %vm2956_vm0, %v2955_v1 }
 0x54c   :  { %2627 = vmatprep.subr.bf16.mxu0 %v2955_v1 }
 0x54f   :  { %2628 = vmatpush3.bf16.msra.mxu0 %v2838_v50 }
 0x550   :  { %2639 = vmatprep.subr.bf16.mxu0 %v2955_v1 }
 0x552   :  { %2630 = vmatmul.mubr.msk.bf16.vlgmr.msra.gmra.mxu0 %vm110_vm1, %v357_v49 }
 0x553   :  { %2641 = vmatprep.mubr.msk.bf16.mxu0 %vm2956_vm0, %v2955_v1 }
 0x5c0   :  { %v374_v51 = vpop.trf.xlu0 }
 0x5c4   :  { %v375_v52 = vpop.trf.xlu0 }
 0x5c5   :  { %v3202_v56 = vpack.c.bf16 %v375_v52, %v374_v51 }
 0x5c8   :  { %v376_v53 = vpop.trf.xlu0 }
 0x5cc   :  { %v377_v54 = vpop.trf.xlu0 }
 0x5cd   :  { %v3198_v55 = vpack.c.bf16 %v377_v54, %v376_v53  ;;  %v2844_v53 = vld [vmem:[%s3556_s13 + $0x8] sm:$0xff]  }
 0x5cf   :  { %2618 = vmatpush3.bf16.msra.mxu1 %v3198_v55 }
 0x5d0   :  { %2619 = vmatprep.subr.bf16.mxu1 %v2955_v1 }
 0x5d3   :  { %2620 = vmatpush3.bf16.msra.mxu1 %v3202_v56 }
 0x5d4   :  { %2633 = vmatprep.subr.bf16.mxu1 %v2955_v1 }
 0x5d6   :  { %2622 = vmatmul.mubr.msk.bf16.vlgmr.msra.gmra.mxu1 %vm110_vm1, %v2839_v57 }
 0x5d7   :  { %2635 = vmatprep.mubr.msk.bf16.mxu1 %vm2956_vm0, %v2955_v1 }
 0x60a   :  { %v445_v58 = vpop.f32.mrf.mxu0 }
 0x60c   :  { %v2615_v59 = vpop.f32.mrf.mxu0 }
 0x60e   :  { %v448_v60 = vpop.f32.mrf.mxu0 }
 0x60f   :  { %v560_v61 = vpack.c.bf16 %v448_v60, %v445_v58 }
 0x610   :  { %v2616_v62 = vpop.f32.mrf.mxu0 }
 0x612   :  { %v553_v63 = vpop.f32.mrf.mxu0 }
 0x614   :  { %v2631_v0 = vpop.f32.mrf.mxu0 }
 0x616   :  { %v556_v2 = vpop.f32.mrf.mxu0 }
 0x617   :  { %v630_v3 = vpack.c.bf16 %v556_v2, %v553_v63 }
 0x618   :  { %v2632_v4 = vpop.f32.mrf.mxu0 }
 0x619   :  { %2640 = vmatpush3.bf16.msra.mxu0 %v630_v3 }
 0x61a   :  { %2653 = vmatprep.subr.bf16.mxu0 %v2955_v1 }
 0x696   :  { %v496_v5 = vpop.f32.mrf.mxu1 }
 0x698   :  { %v2623_v6 = vpop.f32.mrf.mxu1 }
 0x69a   :  { %v499_v7 = vpop.f32.mrf.mxu1 }
 0x69b   :  { %v561_v8 = vpack.c.bf16 %v499_v7, %v496_v5 }
 0x69c   :  { %v2624_v9 = vpop.f32.mrf.mxu1 }
 0x69d   :  { %2634 = vmatpush3.bf16.msra.mxu1 %v561_v8 }
 0x69e   :  { %2645 = vmatprep.subr.bf16.mxu1 %v2955_v1 }
 0x6a0   :  { %2636 = vmatmul.mubr.msk.bf16.vlgmr.msra.gmra.mxu1 %vm562_vm2, %v560_v61 }
 0x6a1   :  { %2646 = vmatpush3.bf16.msra.mxu1 %v2840_v10  ;;  %2649 = vmatprep.mubr.msk.bf16.mxu1 %vm2956_vm0, %v2955_v1 }
 0x6a2   :  { %2647 = vmatprep.subr.bf16.mxu1 %v2955_v1 }
 0x6a5   :  { %2648 = vmatpush3.bf16.msra.mxu1 %v2841_v11 }
 0x6a6   :  { %2661 = vmatprep.subr.bf16.mxu1 %v2955_v1 }
 0x6a8   :  { %2650 = vmatmul.mubr.msk.bf16.vlgmr.msra.gmra.mxu1 %vm110_vm1, %v357_v49 }
 0x6a9   :  { %2662 = vmatpush3.bf16.msra.mxu1 %v2842_v12  ;;  %2665 = vmatprep.mubr.msk.bf16.mxu1 %vm2956_vm0, %v2955_v1 }
 0x6aa   :  { %2663 = vmatprep.subr.bf16.mxu1 %v2955_v1 }
 0x6ad   :  { %2664 = vmatpush3.bf16.msra.mxu1 %v2843_v13 }
 0x6ae   :  { %2675 = vmatprep.subr.bf16.mxu1 %v2955_v1 }
 0x6b0   :  { %2666 = vmatmul.mubr.msk.bf16.vlgmr.msra.gmra.mxu1 %vm110_vm1, %v357_v49 }
 0x6b1   :  { %2677 = vmatprep.mubr.msk.bf16.mxu1 %vm2956_vm0, %v2955_v1 }
 0x760   :  { %v600_v15 = vpop.f32.mrf.mxu1 }
 0x761   :  { %v601_v16 = vadd.f32 %v600_v15, %v3242_v14 }
 0x762   :  { %v2637_v17 = vpop.f32.mrf.mxu1 }
 0x763   :  { %v607_v19 = vsel %vm562_vm2, %v601_v16, -inf }
 0x764   :  { %608 = vmax.xlane.f32.xlu1 %v607_v19  ;;  %v603_v20 = vpop.f32.mrf.mxu1 }
 0x765   :  { %v604_v21 = vadd.f32 %v603_v20, %v3248_v18 }
 0x766   :  { %v2638_v22 = vpop.f32.mrf.mxu1 }
 0x767   :  { %v610_v23 = vsel %vm562_vm2, %v604_v21, -inf }
 0x768   :  { %611 = vmax.xlane.f32.xlu1 %v610_v23  ;;  %v729_v24 = vpop.f32.mrf.mxu1 }
 0x76a   :  { %v2651_v25 = vpop.f32.mrf.mxu1 }
 0x76c   :  { %v732_v26 = vpop.f32.mrf.mxu1 }
 0x76d   :  { %v846_v27 = vpack.c.bf16 %v732_v26, %v729_v24 }
 0x76e   :  { %v2652_v28 = vpop.f32.mrf.mxu1 }
 0x770   :  { %v839_v29 = vpop.f32.mrf.mxu1 }
 0x772   :  { %v2667_v30 = vpop.f32.mrf.mxu1 }
 0x774   :  { %v842_v31 = vpop.f32.mrf.mxu1 }
 0x775   :  { %v915_v32 = vpack.c.bf16 %v842_v31, %v839_v29  ;;  %v2846_v29 = vld [vmem:[%s3558_s15 + $0x8] sm:$0xff]  }
 0x776   :  { %v2668_v33 = vpop.f32.mrf.mxu1 }
 0x777   :  { %2676 = vmatpush3.bf16.msra.mxu1 %v915_v32 }
 0x778   :  { %2687 = vmatprep.subr.bf16.mxu1 %v2955_v1 }
 0x7ed   :  { %v609_v34 = vpop.xlane.xlu1 %608 }
 0x7ee   :  { %v613_v35 = vsub.f32 %v601_v16, %v609_v34 }
 0x7f0   :  { %v615_v36 = vmul.f32 1.442695, %v613_v35 }
 0x7f1   :  { %v612_v37 = vpop.xlane.xlu1 %611 }
 0x7f2   :  { %2885 = vpow2.f32 %v615_v36  ;;  %v614_v38 = vsub.f32 %v604_v21, %v612_v37 }
 0x7f4   :  { %v617_v39 = vmul.f32 1.442695, %v614_v38 }
 0x7f6   :  { %2887 = vpow2.f32 %v617_v39 }
 0x7ff   :  { %v2886_v40 = vpop.eup %2885 }
 0x800   :  { %v619_v41 = vsel %vm562_vm2, %v2886_v40, 0.0 }
 0x801   :  { %620 = vadd.xlane.f32.xlu1 %v619_v41 }
 0x803   :  { %v2888_v42 = vpop.eup %2887 }
 0x804   :  { %v622_v43 = vsel %vm562_vm2, %v2888_v42, 0.0 }
 0x805   :  { %623 = vadd.xlane.f32.xlu1 %v622_v43 }
 0x88a   :  { %v621_v45 = vpop.xlane.xlu1 %620 }
 0x88b   :  { %2889 = vrcp.f32 %v621_v45 }
 0x88e   :  { %v624_v46 = vpop.xlane.xlu1 %623 }
 0x88f   :  { %2891 = vrcp.f32 %v624_v46 }
 0x898   :  { %v2890_v48 = vpop.eup %2889 }
 0x899   :  { %v627_v50 = vmul.f32 %v2890_v48, %v2886_v40 }
 0x89c   :  { %v2892_v49 = vpop.eup %2891 }
 0x89d   :  { %v628_v51 = vmul.f32 %v2892_v49, %v2888_v42 }
 0x89f   :  { %v629_v52 = vpack.c.bf16 %v628_v51, %v627_v50 }
 0x8a1   :  { %2642 = vmatmul.mubr.msk.bf16.vlgmr.msra.gmra.mxu0 %vm562_vm2, %v629_v52 }
 0x8a2   :  { %2654 = vmatpush3.bf16.msra.mxu0 %v3198_v55  ;;  %2657 = vmatprep.mubr.msk.bf16.mxu0 %vm2956_vm0, %v2955_v1 }
 0x8a3   :  { %2655 = vmatprep.subr.bf16.mxu0 %v2955_v1 }
 0x8a6   :  { %2656 = vmatpush3.bf16.msra.mxu0 %v3202_v56 }
 0x8a7   :  { %2669 = vmatprep.subr.bf16.mxu0 %v2955_v1 }
 0x8a9   :  { %2658 = vmatmul.mubr.msk.bf16.vlgmr.msra.gmra.mxu0 %vm110_vm1, %v2844_v53 }
 0x8aa   :  { %2671 = vmatprep.mubr.msk.bf16.mxu0 %vm2956_vm0, %v2955_v1 }
 0x961   :  { %v668_v54 = vpop.f32.mrf.mxu0 }
 0x963   :  { %v2643_v55 = vpop.f32.mrf.mxu0 }
 0x965   :  { %v671_v57 = vpop.f32.mrf.mxu0 }
 0x966   :  { %v675_v58 = vpack.c.bf16 %v671_v57, %v668_v54 }
 0x967   :  { %v2644_v59 = vpop.f32.mrf.mxu0 }
 0x969   :  { %v781_v60 = vpop.f32.mrf.mxu0 }
 0x96b   :  { %v2659_v61 = vpop.f32.mrf.mxu0 }
 0x96c   :  { %v2848_v61 = vld [vmem:[%s3561_s18] sm:$0xff]  }
 0x96d   :  { %v784_v62 = vpop.f32.mrf.mxu0 }
 0x96e   :  { %v847_v63 = vpack.c.bf16 %v784_v62, %v781_v60  ;;  %v2849_v62 = vld [vmem:[%s3563_s20 + $0x18] sm:$0xff]  }
 0x96f   :  { %v2660_v0 = vpop.f32.mrf.mxu0 }
 0x970   :  { %2670 = vmatpush3.bf16.msra.mxu0 %v847_v63 }
 0x971   :  { %2681 = vmatprep.subr.bf16.mxu0 %v2955_v1 }
 0x973   :  { %2672 = vmatmul.mubr.msk.bf16.vlgmr.msra.gmra.mxu0 %vm562_vm2, %v846_v27  ;;  %v2845_v27 = vld [vmem:[%s3558_s15] sm:$0xff]  }
 0x974   :  { %2683 = vmatprep.mubr.msk.bf16.mxu0 %vm2956_vm0, %v2955_v1  ;;  %2682 = vmatpush3.bf16.msra.mxu0 %v2846_v29 }
 0x975   :  { %2693 = vmatprep.subr.bf16.mxu0 %v2955_v1 }
 0xa33   :  { %v885_v56 = vpop.f32.mrf.mxu0 }
 0xa34   :  { %v886_v2 = vadd.f32 %v885_v56, %v3242_v14 }
 0xa35   :  { %v2673_v3 = vpop.f32.mrf.mxu0 }
 0xa36   :  { %v892_v4 = vsel %vm562_vm2, %v886_v2, -inf }
 0xa37   :  { %893 = vmax.xlane.f32.xlu1 %v892_v4  ;;  %v888_v5 = vpop.f32.mrf.mxu0 }
 0xa38   :  { %v889_v6 = vadd.f32 %v888_v5, %v3248_v18 }
 0xa39   :  { %v2674_v7 = vpop.f32.mrf.mxu0 }
 0xa3a   :  { %v895_v8 = vsel %vm562_vm2, %v889_v6, -inf  ;;  %v2410_v7 = vld [vmem:[%s3559_s16] ss:$0 sm:$0xff] }
 0xa3b   :  { %896 = vmax.xlane.f32.xlu1 %v895_v8 }
 0xac0   :  { %v894_v9 = vpop.xlane.xlu1 %893 }
 0xac1   :  { %v898_v10 = vsub.f32 %v886_v2, %v894_v9 }
 0xac3   :  { %v900_v11 = vmul.f32 1.442695, %v898_v10 }
 0xac4   :  { %v897_v12 = vpop.xlane.xlu1 %896 }
 0xac5   :  { %2893 = vpow2.f32 %v900_v11  ;;  %v899_v13 = vsub.f32 %v889_v6, %v897_v12  ;;  %v2411_v11 = vld [vmem:[%s3560_s17] ss:$0 sm:$0xff] }
 0xac7   :  { %v902_v15 = vmul.f32 1.442695, %v899_v13 }
 0xac9   :  { %2895 = vpow2.f32 %v902_v15 }
 0xad2   :  { %v2894_v16 = vpop.eup %2893 }
 0xad3   :  { %v904_v17 = vsel %vm562_vm2, %v2894_v16, 0.0 }
 0xad4   :  { %905 = vadd.xlane.f32.xlu1 %v904_v17  ;;  %v2850_v17 = vld [vmem:[%s3563_s20 + $0x10] sm:$0xff]  }
 0xad6   :  { %v2896_v19 = vpop.eup %2895 }
 0xad7   :  { %v907_v20 = vsel %vm562_vm2, %v2896_v19, 0.0 }
 0xad8   :  { %908 = vadd.xlane.f32.xlu1 %v907_v20  ;;  %v2852_v20 = vld [vmem:[%s3563_s20] sm:$0xff]  }
 0xb5d   :  { %v906_v21 = vpop.xlane.xlu1 %905 }
 0xb5e   :  { %2897 = vrcp.f32 %v906_v21  ;;  %v2412_v21 = vld [vmem:[%s3562_s19] ss:$0 sm:$0xff] }
 0xb61   :  { %v909_v22 = vpop.xlane.xlu1 %908 }
 0xb62   :  { %2899 = vrcp.f32 %v909_v22 }
 0xb6b   :  { %v2898_v23 = vpop.eup %2897 }
 0xb6c   :  { %v912_v25 = vmul.f32 %v2898_v23, %v2894_v16 }
 0xb6f   :  { %v2900_v24 = vpop.eup %2899 }
 0xb70   :  { %v913_v26 = vmul.f32 %v2900_v24, %v2896_v19  ;;  %v2851_v19 = vld [vmem:[%s3563_s20 + $0x8] sm:$0xff]  }
 0xb72   :  { %v914_v28 = vpack.c.bf16 %v913_v26, %v912_v25 }
 0xb74   :  { %2678 = vmatmul.mubr.msk.bf16.vlgmr.msra.gmra.mxu1 %vm562_vm2, %v914_v28 }
 0xb75   :  { %2688 = vmatpush3.bf16.msra.mxu1 %v2845_v27  ;;  %2689 = vmatprep.mubr.msk.bf16.mxu1 %vm2956_vm0, %v2955_v1 }
 0xb76   :  { %2701 = vmatprep.subr.bf16.mxu1 %v2955_v1 }
 0xb7c   :  { %2690 = vmatmul.mubr.msk.bf16.vlgmr.msra.gmra.mxu1 %vm562_vm2, %v675_v58 }
 0xb7d   :  { %2709 = vmatprep.mubr.msk.bf16.mxu1 %vm2956_vm0, %v2955_v1  ;;  %2702 = vmatpush3.bf16.msra.mxu1 %v2849_v62 }
 0xb7e   :  { %2703 = vmatprep.subr.bf16.mxu1 %v2955_v1 }
 0xb81   :  { %2704 = vmatpush3.bf16.msra.mxu1 %v2850_v17  ;;  %v2857_v17 = vld [vmem:[%s3556_s13 + $0x10] sm:$0xff]  }
 0xb82   :  { %2705 = vmatprep.subr.bf16.mxu1 %v2955_v1 }
 0xb85   :  { %2706 = vmatpush3.bf16.msra.mxu1 %v2851_v19 }
 0xb86   :  { %2707 = vmatprep.subr.bf16.mxu1 %v2955_v1 }
 0xb89   :  { %2708 = vmatpush3.bf16.msra.mxu1 %v2852_v20 }
 0xb8a   :  { %2729 = vmatprep.subr.bf16.mxu1 %v2955_v1 }
 0xc34   :  { %v953_v30 = vpop.f32.mrf.mxu1 }
 0xc36   :  { %v2679_v31 = vpop.f32.mrf.mxu1 }
 0xc37   :  { %v2416_v31 = vld [vmem:[%s3564_s21] ss:$0 sm:$0xff] }
 0xc38   :  { %v956_v32 = vpop.f32.mrf.mxu1 }
 0xc39   :  { %v960_v33 = vpack.c.bf16 %v956_v32, %v953_v30 }
 0xc3a   :  { %v2680_v34 = vpop.f32.mrf.mxu1 }
 0xc3b   :  { %2684 = vmatmul.mubr.msk.bf16.vlgmr.msra.gmra.mxu0 %vm562_vm2, %v960_v33 }
 0xc3c   :  { %v1057_v35 = vpop.f32.mrf.mxu1  ;;  %2697 = vmatprep.mubr.msk.bf16.mxu0 %vm2956_vm0, %v2955_v1 }
 0xc3e   :  { %v2691_v36 = vpop.f32.mrf.mxu1 }
 0xc40   :  { %v1060_v37 = vpop.f32.mrf.mxu1 }
 0xc42   :  { %v2692_v38 = vpop.f32.mrf.mxu1 }
 0xcfb   :  { %v1007_v39 = vpop.f32.mrf.mxu0 }
 0xcfc   :  { %v1058_v40 = vadd.f32 %v1057_v35, %v1007_v39 }
 0xcfd   :  { %v2685_v41 = vpop.f32.mrf.mxu0 }
 0xcfe   :  { %v1064_v42 = vadd.f32 %v1058_v40, %v3176_v44 }
 0xcff   :  { %v1010_v43 = vpop.f32.mrf.mxu0 }
 0xd00   :  { %v1061_v45 = vadd.f32 %v1060_v37, %v1010_v43  ;;  %v1068_v46 = vsel %vm110_vm1, %v1064_v42, 0.0 }
 0xd01   :  { %1069 = vadd.xlane.f32.xlu1 %v1068_v46  ;;  %v2686_v48 = vpop.f32.mrf.mxu0 }
 0xd02   :  { %v1065_v49 = vadd.f32 %v1061_v45, %v3179_v47  ;;  %v2847_v47 = vld [vmem:[%s3561_s18 + $0x8] sm:$0xff]  }
 0xd03   :  { %2694 = vmatpush3.bf16.msra.mxu0 %v2847_v47 }
 0xd04   :  { %v1071_v50 = vsel %vm110_vm1, %v1065_v49, 0.0  ;;  %2695 = vmatprep.subr.bf16.mxu0 %v2955_v1 }
 0xd05   :  { %1072 = vadd.xlane.f32.xlu1 %v1071_v50 }
 0xd07   :  { %2696 = vmatpush3.bf16.msra.mxu0 %v2848_v61 }
 0xd08   :  { %2713 = vmatprep.subr.bf16.mxu0 %v2955_v1 }
 0xd8a   :  { %v1070_v51 = vpop.xlane.xlu1 %1069 }
 0xd8b   :  { %v1074_v52 = vmul.f32 0.03125, %v1070_v51 }
 0xd8d   :  { %v1076_v53 = vsub.f32 %v1064_v42, %v1074_v52 }
 0xd8e   :  { %v1073_v54 = vpop.xlane.xlu1 %1072 }
 0xd8f   :  { %v1075_v55 = vmul.f32 0.03125, %v1073_v54  ;;  %v1078_v57 = vmul.f32 %v1076_v53, %v1076_v53  ;;  %v2853_v54 = vld [vmem:[%s3555_s12 + $0x28] sm:$0xff]  }
 0xd91   :  { %v1077_v58 = vsub.f32 %v1065_v49, %v1075_v55  ;;  %v1080_v44 = vsel %vm110_vm1, %v1078_v57, 0.0  ;;  %v2854_v55 = vld [vmem:[%s3557_s14 + $0x28] sm:$0xff]   ;;  %v2855_v57 = vld [vmem:[%s3555_s12 + $0x20] sm:$0xff]  }
 0xd92   :  { %1081 = vadd.xlane.f32.xlu1 %v1080_v44 }
 0xd93   :  { %v1079_v59 = vmul.f32 %v1077_v58, %v1077_v58 }
 0xd95   :  { %v1083_v60 = vsel %vm110_vm1, %v1079_v59, 0.0 }
 0xd96   :  { %1084 = vadd.xlane.f32.xlu1 %v1083_v60 }
 0xe1b   :  { %v1082_v63 = vpop.xlane.xlu1 %1081 }
 0xe1c   :  { %v1086_v0 = vmul.f32 0.03125, %v1082_v63 }
 0xe1e   :  { %v1088_v56 = vadd.f32 1e-06, %v1086_v0  ;;  %v2422_v0 = vld [vmem:[%s3565_s22] ss:$0 sm:$0xff] }
 0xe1f   :  { %v1085_v2 = vpop.xlane.xlu1 %1084 }
 0xe20   :  { %2901 = vrsqrt.f32 %v1088_v56  ;;  %v1087_v3 = vmul.f32 0.03125, %v1085_v2  ;;  %v2423_v2 = vld [vmem:[%s3566_s23] ss:$0 sm:$0xff] }
 0xe22   :  { %v1089_v4 = vadd.f32 1e-06, %v1087_v3 }
 0xe24   :  { %2903 = vrsqrt.f32 %v1089_v4 }
 0xe2d   :  { %v2902_v5 = vpop.eup %2901 }
 0xe2e   :  { %v1092_v6 = vmul.f32 %v2902_v5, %v1076_v53 }
 0xe30   :  { %v1100_v10 = vmul.f32 %v2410_v7, %v1092_v6 }
 0xe31   :  { %v2904_v8 = vpop.eup %2903 }
 0xe32   :  { %v1093_v9 = vmul.f32 %v2904_v8, %v1077_v58  ;;  %v1108_v13 = vadd.f32 %v2411_v11, %v1100_v10  ;;  %v2856_v58 = vld [vmem:[%s3557_s14 + $0x20] sm:$0xff]  }
 0xe34   :  { %v1101_v12 = vmul.f32 %v2410_v7, %v1093_v9 }
 0xe36   :  { %v1109_v15 = vadd.f32 %v2411_v11, %v1101_v12 }
 0xe38   :  { %v1110_v16 = vpack.c.bf16 %v1109_v15, %v1108_v13 }
 0xe3a   :  { %2698 = vmatmul.mubr.msk.bf16.vlgmr.msra.gmra.mxu0 %vm110_vm1, %v1110_v16 }
 0xe3b   :  { %2717 = vmatprep.mubr.msk.bf16.mxu0 %vm2956_vm0, %v2955_v1  ;;  %2714 = vmatpush3.bf16.msra.mxu0 %v2853_v54 }
 0xe3c   :  { %2715 = vmatprep.subr.bf16.mxu0 %v2955_v1 }
 0xe3f   :  { %2716 = vmatpush3.bf16.msra.mxu0 %v2855_v57 }
 0xe40   :  { %2721 = vmatprep.subr.bf16.mxu0 %v2955_v1 }
 0xefa   :  { %v1171_v22 = vpop.f32.mrf.mxu0 }
 0xefb   :  { %v1172_v24 = vadd.f32 %v2412_v21, %v1171_v22 }
 0xefc   :  { %v2699_v23 = vpop.f32.mrf.mxu0 }
 0xefd   :  { %v1178_v28 = vmax.f32 %v1172_v24, 0.0 }
 0xefe   :  { %v1174_v25 = vpop.f32.mrf.mxu0 }
 0xeff   :  { %v1175_v26 = vadd.f32 %v2412_v21, %v1174_v25 }
 0xf00   :  { %v2700_v27 = vpop.f32.mrf.mxu0 }
 0xf01   :  { %v1179_v29 = vmax.f32 %v1175_v26, 0.0 }
 0xf03   :  { %v1180_v30 = vpack.c.bf16 %v1179_v29, %v1178_v28 }
 0xf05   :  { %2710 = vmatmul.mubr.msk.bf16.vlgmr.msra.gmra.mxu1 %vm1220_vm3, %v1180_v30 }
 0xf06   :  { %2733 = vmatprep.mubr.msk.bf16.mxu1 %vm2956_vm0, %v2955_v1  ;;  %2730 = vmatpush3.bf16.msra.mxu1 %v2854_v55 }
 0xf07   :  { %2731 = vmatprep.subr.bf16.mxu1 %v2955_v1 }
 0xf0a   :  { %2732 = vmatpush3.bf16.msra.mxu1 %v2856_v58 }
 0xf0b   :  { %2743 = vmatprep.subr.bf16.mxu1 %v2955_v1 }
 0xfc5   :  { %v1258_v32 = vpop.f32.mrf.mxu1 }
 0xfc6   :  { %v1259_v33 = vadd.f32 %v2416_v31, %v1258_v32 }
 0xfc7   :  { %v2711_v34 = vpop.f32.mrf.mxu1 }
 0xfc8   :  { %v1265_v35 = vadd.f32 %v1259_v33, %v1108_v13  ;;  %v2858_v34 = vld [vmem:[%s3555_s12 + $0x38] sm:$0xff]  }
 0xfc9   :  { %v1261_v36 = vpop.f32.mrf.mxu1 }
 0xfca   :  { %v1262_v37 = vadd.f32 %v2416_v31, %v1261_v36  ;;  %v1269_v38 = vsel %vm110_vm1, %v1265_v35, 0.0  ;;  %v2860_v36 = vld [vmem:[%s3557_s14 + $0x38] sm:$0xff]  }
 0xfcb   :  { %1270 = vadd.xlane.f32.xlu1 %v1269_v38  ;;  %v2712_v39 = vpop.f32.mrf.mxu1 }
 0xfcc   :  { %v1266_v40 = vadd.f32 %v1262_v37, %v1109_v15  ;;  %v2861_v37 = vld [vmem:[%s3557_s14 + $0x30] sm:$0xff]  }
 0xfce   :  { %v1272_v41 = vsel %vm110_vm1, %v1266_v40, 0.0 }
 0xfcf   :  { %1273 = vadd.xlane.f32.xlu0 %v1272_v41 }
0x1054   :  { %v1271_v42 = vpop.xlane.xlu1 %1270 }
0x1055   :  { %v1275_v43 = vmul.f32 0.03125, %v1271_v42 }
0x1057   :  { %v1277_v45 = vsub.f32 %v1265_v35, %v1275_v43  ;;  %v2859_v35 = vld [vmem:[%s3555_s12 + $0x30] sm:$0xff]  }
0x1058   :  { %v1274_v46 = vpop.xlane.xlu0 %1273 }
0x1059   :  { %v1276_v48 = vmul.f32 0.03125, %v1274_v46  ;;  %v1279_v49 = vmul.f32 %v1277_v45, %v1277_v45 }
0x105b   :  { %v1278_v50 = vsub.f32 %v1266_v40, %v1276_v48  ;;  %v1281_v51 = vsel %vm110_vm1, %v1279_v49, 0.0 }
0x105c   :  { %1282 = vadd.xlane.f32.xlu1 %v1281_v51 }
0x105d   :  { %v1280_v52 = vmul.f32 %v1278_v50, %v1278_v50 }
0x105f   :  { %v1284_v53 = vsel %vm110_vm1, %v1280_v52, 0.0 }
0x1060   :  { %1285 = vadd.xlane.f32.xlu1 %v1284_v53 }
0x10e5   :  { %v1283_v44 = vpop.xlane.xlu1 %1282 }
0x10e6   :  { %v1287_v59 = vmul.f32 0.03125, %v1283_v44 }
0x10e8   :  { %v1289_v60 = vadd.f32 1e-06, %v1287_v59 }
0x10e9   :  { %v1286_v47 = vpop.xlane.xlu1 %1285 }
0x10ea   :  { %2905 = vrsqrt.f32 %v1289_v60  ;;  %v1288_v61 = vmul.f32 0.03125, %v1286_v47 }
0x10ec   :  { %v1290_v62 = vadd.f32 1e-06, %v1288_v61 }
0x10ee   :  { %2907 = vrsqrt.f32 %v1290_v62 }
0x10f7   :  { %v2906_v63 = vpop.eup %2905 }
0x10f8   :  { %v1293_v56 = vmul.f32 %v2906_v63, %v1277_v45 }
0x10fa   :  { %v1301_v3 = vmul.f32 %v2422_v0, %v1293_v56 }
0x10fb   :  { %v2908_v4 = vpop.eup %2907 }
0x10fc   :  { %v3370_v5 = vadd.f32 %v2423_v2, %v1301_v3  ;;  %v1294_v6 = vmul.f32 %v2908_v4, %v1278_v50 }
0x10fe   :  { %1312 = vxpose.xlu1.b32.start [1/2] (short) (narrow) %v3370_v5, 32  ;;  %v1302_v7 = vmul.f32 %v2422_v0, %v1294_v6 }
0x1100   :  { %v3373_v8 = vadd.f32 %v2423_v2, %v1302_v7 }
0x1102   :  { %1313 = vxpose.xlu1.b32.end [2/2] (short) (narrow) %v3373_v8, 32  ;;  %v1311_v9 = vpack.c.bf16 %v3373_v8, %v3370_v5 }
0x1104   :  { %2718 = vmatmul.mubr.msk.bf16.vlgmr.msra.gmra.mxu0 %vm110_vm1, %v1311_v9  ;;  %2734 = vmatmul.mubr.msk.bf16.vlgmr.msra.gmra.mxu1 %vm110_vm1, %v1311_v9 }
0x1105   :  { %2725 = vmatprep.mubr.msk.bf16.mxu0 %vm2956_vm0, %v2955_v1  ;;  %2745 = vmatprep.mubr.msk.bf16.mxu1 %vm2956_vm0, %v2955_v1 }
0x117a   :  { %v1328_v10 = vpop.trf.xlu1 }
0x117e   :  { %v1329_v11 = vpop.trf.xlu1 }
0x117f   :  { %v3388_v16 = vpack.c.bf16 %v1329_v11, %v1328_v10 }
0x1182   :  { %v1330_v12 = vpop.trf.xlu1 }
0x1186   :  { %v1331_v13 = vpop.trf.xlu1 }
0x1187   :  { %v3384_v15 = vpack.c.bf16 %v1331_v13, %v1330_v12  ;;  %v2862_v12 = vld [vmem:[%s3556_s13 + $0x18] sm:$0xff]  }
0x1189   :  { %2722 = vmatpush3.bf16.msra.mxu0 %v3384_v15 }
0x118a   :  { %2723 = vmatprep.subr.bf16.mxu0 %v2955_v1 }
0x118d   :  { %2724 = vmatpush3.bf16.msra.mxu0 %v3388_v16 }
0x118e   :  { %2737 = vmatprep.subr.bf16.mxu0 %v2955_v1 }
0x1190   :  { %2726 = vmatmul.mubr.msk.bf16.vlgmr.msra.gmra.mxu0 %vm110_vm1, %v2857_v17 }
0x1191   :  { %2739 = vmatprep.mubr.msk.bf16.mxu0 %vm2956_vm0, %v2955_v1 }
0x11c4   :  { %v1400_v19 = vpop.f32.mrf.mxu0  ;;  %v1510_v20 = vpop.f32.mrf.mxu1 }
0x11c6   :  { %v2719_v21 = vpop.f32.mrf.mxu0  ;;  %v2735_v22 = vpop.f32.mrf.mxu1 }
0x11c8   :  { %v1403_v23 = vpop.f32.mrf.mxu0  ;;  %v1513_v24 = vpop.f32.mrf.mxu1 }
0x11c9   :  { %v1517_v25 = vpack.c.bf16 %v1403_v23, %v1400_v19  ;;  %v1586_v26 = vpack.c.bf16 %v1513_v24, %v1510_v20 }
0x11ca   :  { %v2720_v27 = vpop.f32.mrf.mxu0  ;;  %v2736_v28 = vpop.f32.mrf.mxu1 }
0x11cb   :  { %2744 = vmatpush3.bf16.msra.mxu1 %v1586_v26 }
0x11cc   :  { %2757 = vmatprep.subr.bf16.mxu1 %v2955_v1 }
0x1250   :  { %v1452_v29 = vpop.f32.mrf.mxu0 }
0x1252   :  { %v2727_v30 = vpop.f32.mrf.mxu0 }
0x1254   :  { %v1455_v31 = vpop.f32.mrf.mxu0 }
0x1255   :  { %v1518_v32 = vpack.c.bf16 %v1455_v31, %v1452_v29 }
0x1256   :  { %v2728_v33 = vpop.f32.mrf.mxu0 }
0x1257   :  { %2738 = vmatpush3.bf16.msra.mxu0 %v1518_v32 }
0x1258   :  { %2749 = vmatprep.subr.bf16.mxu0 %v2955_v1 }
0x125a   :  { %2740 = vmatmul.mubr.msk.bf16.vlgmr.msra.gmra.mxu0 %vm562_vm2, %v1517_v25 }
0x125b   :  { %2750 = vmatpush3.bf16.msra.mxu0 %v2858_v34  ;;  %2753 = vmatprep.mubr.msk.bf16.mxu0 %vm2956_vm0, %v2955_v1 }
0x125c   :  { %2751 = vmatprep.subr.bf16.mxu0 %v2955_v1 }
0x125f   :  { %2752 = vmatpush3.bf16.msra.mxu0 %v2859_v35 }
0x1260   :  { %2765 = vmatprep.subr.bf16.mxu0 %v2955_v1 }
0x1262   :  { %2754 = vmatmul.mubr.msk.bf16.vlgmr.msra.gmra.mxu0 %vm110_vm1, %v1311_v9 }
0x1263   :  { %2766 = vmatpush3.bf16.msra.mxu0 %v2860_v36  ;;  %2769 = vmatprep.mubr.msk.bf16.mxu0 %vm2956_vm0, %v2955_v1 }
0x1264   :  { %2767 = vmatprep.subr.bf16.mxu0 %v2955_v1 }
0x1267   :  { %2768 = vmatpush3.bf16.msra.mxu0 %v2861_v37 }
0x1268   :  { %2779 = vmatprep.subr.bf16.mxu0 %v2955_v1 }
0x126a   :  { %2770 = vmatmul.mubr.msk.bf16.vlgmr.msra.gmra.mxu0 %vm110_vm1, %v1311_v9 }
0x126b   :  { %2781 = vmatprep.mubr.msk.bf16.mxu0 %vm2956_vm0, %v2955_v1 }
0x131a   :  { %v1556_v38 = vpop.f32.mrf.mxu0 }
0x131b   :  { %v1557_v39 = vadd.f32 %v1556_v38, %v3242_v14 }
0x131c   :  { %v2741_v40 = vpop.f32.mrf.mxu0 }
0x131d   :  { %v1563_v41 = vsel %vm562_vm2, %v1557_v39, -inf }
0x131e   :  { %1564 = vmax.xlane.f32.xlu0 %v1563_v41  ;;  %v1559_v42 = vpop.f32.mrf.mxu0 }
0x131f   :  { %v1560_v43 = vadd.f32 %v1559_v42, %v3248_v18 }
0x1320   :  { %v2742_v45 = vpop.f32.mrf.mxu0 }
0x1321   :  { %v1566_v46 = vsel %vm562_vm2, %v1560_v43, -inf }
0x1322   :  { %1567 = vmax.xlane.f32.xlu0 %v1566_v46  ;;  %v1686_v48 = vpop.f32.mrf.mxu0 }
0x1324   :  { %v2755_v49 = vpop.f32.mrf.mxu0 }
0x1325   :  { %v2863_v49 = vld [vmem:[%s3558_s15 + $0x10] sm:$0xff]  }
0x1326   :  { %v1689_v50 = vpop.f32.mrf.mxu0 }
0x1327   :  { %v1803_v51 = vpack.c.bf16 %v1689_v50, %v1686_v48 }
0x1328   :  { %v2756_v52 = vpop.f32.mrf.mxu0 }
0x132a   :  { %v1796_v53 = vpop.f32.mrf.mxu0 }
0x132c   :  { %v2771_v54 = vpop.f32.mrf.mxu0 }
0x132e   :  { %v1799_v55 = vpop.f32.mrf.mxu0 }
0x132f   :  { %v1872_v57 = vpack.c.bf16 %v1799_v55, %v1796_v53 }
0x1330   :  { %v2772_v58 = vpop.f32.mrf.mxu0 }
0x1331   :  { %2780 = vmatpush3.bf16.msra.mxu0 %v1872_v57 }
0x1332   :  { %2791 = vmatprep.subr.bf16.mxu0 %v2955_v1 }
0x13a7   :  { %v1565_v44 = vpop.xlane.xlu0 %1564 }
0x13a8   :  { %v1569_v59 = vsub.f32 %v1557_v39, %v1565_v44 }
0x13aa   :  { %v1571_v60 = vmul.f32 1.442695, %v1569_v59 }
0x13ab   :  { %v1568_v47 = vpop.xlane.xlu0 %1567 }
0x13ac   :  { %2909 = vpow2.f32 %v1571_v60  ;;  %v1570_v61 = vsub.f32 %v1560_v43, %v1568_v47 }
0x13ae   :  { %v1573_v62 = vmul.f32 1.442695, %v1570_v61 }
0x13b0   :  { %2911 = vpow2.f32 %v1573_v62 }
0x13b9   :  { %v2910_v63 = vpop.eup %2909 }
0x13ba   :  { %v1575_v0 = vsel %vm562_vm2, %v2910_v63, 0.0 }
0x13bb   :  { %1576 = vadd.xlane.f32.xlu0 %v1575_v0 }
0x13bd   :  { %v2912_v56 = vpop.eup %2911 }
0x13be   :  { %v1578_v2 = vsel %vm562_vm2, %v2912_v56, 0.0 }
0x13bf   :  { %1579 = vadd.xlane.f32.xlu0 %v1578_v2 }
0x1444   :  { %v1577_v3 = vpop.xlane.xlu0 %1576 }
0x1445   :  { %2913 = vrcp.f32 %v1577_v3 }
0x1448   :  { %v1580_v4 = vpop.xlane.xlu0 %1579 }
0x1449   :  { %2915 = vrcp.f32 %v1580_v4 }
0x1452   :  { %v2914_v6 = vpop.eup %2913 }
0x1453   :  { %v1583_v9 = vmul.f32 %v2914_v6, %v2910_v63 }
0x1456   :  { %v2916_v7 = vpop.eup %2915 }
0x1457   :  { %v1584_v10 = vmul.f32 %v2916_v7, %v2912_v56 }
0x1459   :  { %v1585_v11 = vpack.c.bf16 %v1584_v10, %v1583_v9 }
0x145b   :  { %2746 = vmatmul.mubr.msk.bf16.vlgmr.msra.gmra.mxu1 %vm562_vm2, %v1585_v11 }
0x145c   :  { %2758 = vmatpush3.bf16.msra.mxu1 %v3384_v15  ;;  %2761 = vmatprep.mubr.msk.bf16.mxu1 %vm2956_vm0, %v2955_v1 }
0x145d   :  { %2759 = vmatprep.subr.bf16.mxu1 %v2955_v1 }
0x1460   :  { %2760 = vmatpush3.bf16.msra.mxu1 %v3388_v16 }
0x1461   :  { %2773 = vmatprep.subr.bf16.mxu1 %v2955_v1 }
0x1463   :  { %2762 = vmatmul.mubr.msk.bf16.vlgmr.msra.gmra.mxu1 %vm110_vm1, %v2862_v12 }
0x1464   :  { %2775 = vmatprep.mubr.msk.bf16.mxu1 %vm2956_vm0, %v2955_v1 }
0x151b   :  { %v1624_v13 = vpop.f32.mrf.mxu1 }
0x151d   :  { %v2747_v15 = vpop.f32.mrf.mxu1 }
0x151f   :  { %v1627_v17 = vpop.f32.mrf.mxu1 }
0x1520   :  { %v1631_v19 = vpack.c.bf16 %v1627_v17, %v1624_v13 }
0x1521   :  { %v2748_v20 = vpop.f32.mrf.mxu1 }
0x1522   :  { %v2866_v20 = vld [vmem:[%s3561_s18 + $0x10] sm:$0xff]  }
0x1523   :  { %v1738_v21 = vpop.f32.mrf.mxu1 }
0x1525   :  { %v2763_v22 = vpop.f32.mrf.mxu1 }
0x1527   :  { %v1741_v23 = vpop.f32.mrf.mxu1 }
0x1528   :  { %v1804_v24 = vpack.c.bf16 %v1741_v23, %v1738_v21  ;;  %v2867_v21 = vld [vmem:[%s3563_s20 + $0x38] sm:$0xff]  }
0x1529   :  { %v2764_v25 = vpop.f32.mrf.mxu1 }
0x152a   :  { %2774 = vmatpush3.bf16.msra.mxu1 %v1804_v24 }
0x152b   :  { %2785 = vmatprep.subr.bf16.mxu1 %v2955_v1 }
0x152d   :  { %2776 = vmatmul.mubr.msk.bf16.vlgmr.msra.gmra.mxu1 %vm562_vm2, %v1803_v51  ;;  %v2864_v51 = vld [vmem:[%s3558_s15 + $0x18] sm:$0xff]  }
0x152e   :  { %2787 = vmatprep.mubr.msk.bf16.mxu1 %vm2956_vm0, %v2955_v1  ;;  %2786 = vmatpush3.bf16.msra.mxu1 %v2864_v51  ;;  %v2494_v51 = vld [vmem:[%s3564_s21 + $0x1] ss:$0 sm:$0xff] }
0x152f   :  { %2797 = vmatprep.subr.bf16.mxu1 %v2955_v1 }
0x15ed   :  { %v1842_v16 = vpop.f32.mrf.mxu1 }
0x15ee   :  { %v1843_v26 = vadd.f32 %v1842_v16, %v3242_v14 }
0x15ef   :  { %v2777_v27 = vpop.f32.mrf.mxu1 }
0x15f0   :  { %v1849_v28 = vsel %vm562_vm2, %v1843_v26, -inf }
0x15f1   :  { %1850 = vmax.xlane.f32.xlu1 %v1849_v28  ;;  %v1845_v29 = vpop.f32.mrf.mxu1 }
0x15f2   :  { %v1846_v30 = vadd.f32 %v1845_v29, %v3248_v18  ;;  %v2474_v29 = vld [vmem:[%s3559_s16 + $0x1] ss:$0 sm:$0xff] }
0x15f3   :  { %v2778_v31 = vpop.f32.mrf.mxu1 }
0x15f4   :  { %v1852_v32 = vsel %vm562_vm2, %v1846_v30, -inf }
0x15f5   :  { %1853 = vmax.xlane.f32.xlu0 %v1852_v32 }
0x167a   :  { %v1851_v33 = vpop.xlane.xlu1 %1850 }
0x167b   :  { %v1855_v34 = vsub.f32 %v1843_v26, %v1851_v33  ;;  %v2475_v33 = vld [vmem:[%s3560_s17 + $0x1] ss:$0 sm:$0xff] }
0x167d   :  { %v1857_v35 = vmul.f32 1.442695, %v1855_v34 }
0x167e   :  { %v1854_v36 = vpop.xlane.xlu0 %1853 }
0x167f   :  { %2917 = vpow2.f32 %v1857_v35  ;;  %v1856_v37 = vsub.f32 %v1846_v30, %v1854_v36 }
0x1681   :  { %v1859_v38 = vmul.f32 1.442695, %v1856_v37 }
0x1683   :  { %2919 = vpow2.f32 %v1859_v38  ;;  %v2868_v38 = vld [vmem:[%s3563_s20 + $0x30] sm:$0xff]  }
0x168c   :  { %v2918_v14 = vpop.eup %2917 }
0x168d   :  { %v1861_v39 = vsel %vm562_vm2, %v2918_v14, 0.0 }
0x168e   :  { %1862 = vadd.xlane.f32.xlu0 %v1861_v39  ;;  %v2870_v39 = vld [vmem:[%s3563_s20 + $0x20] sm:$0xff]  }
0x1690   :  { %v2920_v40 = vpop.eup %2919 }
0x1691   :  { %v1864_v41 = vsel %vm562_vm2, %v2920_v40, 0.0 }
0x1692   :  { %1865 = vadd.xlane.f32.xlu0 %v1864_v41 }
0x1717   :  { %v1863_v18 = vpop.xlane.xlu0 %1862 }
0x1718   :  { %2921 = vrcp.f32 %v1863_v18 }
0x171b   :  { %v1866_v42 = vpop.xlane.xlu0 %1865 }
0x171c   :  { %2923 = vrcp.f32 %v1866_v42 }
0x1725   :  { %v2922_v43 = vpop.eup %2921 }
0x1726   :  { %v1869_v46 = vmul.f32 %v2922_v43, %v2918_v14  ;;  %v2869_v14 = vld [vmem:[%s3563_s20 + $0x28] sm:$0xff]  }
0x1729   :  { %v2924_v45 = vpop.eup %2923 }
0x172a   :  { %v1870_v48 = vmul.f32 %v2924_v45, %v2920_v40  ;;  %v2481_v40 = vld [vmem:[%s3562_s19 + $0x1] ss:$0 sm:$0xff] }
0x172c   :  { %v1871_v50 = vpack.c.bf16 %v1870_v48, %v1869_v46 }
0x172e   :  { %2782 = vmatmul.mubr.msk.bf16.vlgmr.msra.gmra.mxu0 %vm562_vm2, %v1871_v50 }
0x172f   :  { %2792 = vmatpush3.bf16.msra.mxu0 %v2863_v49  ;;  %2793 = vmatprep.mubr.msk.bf16.mxu0 %vm2956_vm0, %v2955_v1 }
0x1730   :  { %2805 = vmatprep.subr.bf16.mxu0 %v2955_v1 }
0x1736   :  { %2794 = vmatmul.mubr.msk.bf16.vlgmr.msra.gmra.mxu0 %vm562_vm2, %v1631_v19 }
0x1737   :  { %2813 = vmatprep.mubr.msk.bf16.mxu0 %vm2956_vm0, %v2955_v1  ;;  %2806 = vmatpush3.bf16.msra.mxu0 %v2867_v21 }
0x1738   :  { %2807 = vmatprep.subr.bf16.mxu0 %v2955_v1 }
0x173b   :  { %2808 = vmatpush3.bf16.msra.mxu0 %v2868_v38 }
0x173c   :  { %2809 = vmatprep.subr.bf16.mxu0 %v2955_v1 }
0x173f   :  { %2810 = vmatpush3.bf16.msra.mxu0 %v2869_v14 }
0x1740   :  { %2811 = vmatprep.subr.bf16.mxu0 %v2955_v1 }
0x1743   :  { %2812 = vmatpush3.bf16.msra.mxu0 %v2870_v39 }
0x17ee   :  { %v1910_v52 = vpop.f32.mrf.mxu0 }
0x17f0   :  { %v2783_v53 = vpop.f32.mrf.mxu0 }
0x17f2   :  { %v1913_v54 = vpop.f32.mrf.mxu0 }
0x17f3   :  { %v1917_v55 = vpack.c.bf16 %v1913_v54, %v1910_v52 }
0x17f4   :  { %v2784_v57 = vpop.f32.mrf.mxu0 }
0x17f5   :  { %2788 = vmatmul.mubr.msk.bf16.vlgmr.msra.gmra.mxu1 %vm562_vm2, %v1917_v55 }
0x17f6   :  { %v2014_v58 = vpop.f32.mrf.mxu0  ;;  %2801 = vmatprep.mubr.msk.bf16.mxu1 %vm2956_vm0, %v2955_v1 }
0x17f8   :  { %v2795_v44 = vpop.f32.mrf.mxu0 }
0x17fa   :  { %v2017_v59 = vpop.f32.mrf.mxu0 }
0x17fc   :  { %v2796_v60 = vpop.f32.mrf.mxu0 }
0x18b5   :  { %v1964_v47 = vpop.f32.mrf.mxu1 }
0x18b6   :  { %v2015_v61 = vadd.f32 %v2014_v58, %v1964_v47 }
0x18b7   :  { %v2789_v62 = vpop.f32.mrf.mxu1 }
0x18b8   :  { %v2021_v63 = vadd.f32 %v2015_v61, %v3370_v5 }
0x18b9   :  { %v1967_v0 = vpop.f32.mrf.mxu1 }
0x18ba   :  { %v2018_v56 = vadd.f32 %v2017_v59, %v1967_v0  ;;  %v2027_v2 = vsel %vm110_vm1, %v2021_v63, 0.0 }
0x18bb   :  { %v2790_v3 = vpop.f32.mrf.mxu1  ;;  %2028 = vadd.xlane.f32.xlu0 %v2027_v2 }
0x18bc   :  { %v2022_v4 = vadd.f32 %v2018_v56, %v3373_v8  ;;  %v2865_v8 = vld [vmem:[%s3561_s18 + $0x18] sm:$0xff]  }
0x18bd   :  { %2798 = vmatpush3.bf16.msra.mxu1 %v2865_v8 }
0x18be   :  { %v2030_v6 = vsel %vm110_vm1, %v2022_v4, 0.0  ;;  %2799 = vmatprep.subr.bf16.mxu1 %v2955_v1 }
0x18bf   :  { %2031 = vadd.xlane.f32.xlu0 %v2030_v6 }
0x18c1   :  { %2800 = vmatpush3.bf16.msra.mxu1 %v2866_v20  ;;  %v2502_v20 = vld [vmem:[%s3565_s22 + $0x1] ss:$0 sm:$0xff]  ;;  %s2957_s22 = smov [#allocation2]  }
0x18c2   :  { %2817 = vmatprep.subr.bf16.mxu1 %v2955_v1  ;;  %s2350_s29 = sshll.u32 %s2957_s22, 4  ;;  %s2351_s29 = int_to_ptr.vmem [resolvable:$true] %s2350_s29 }
0x18c3   :  { %p2938_p1 = scmp.lt.s32.totalorder %s2351_s29, %s2351_s29 }
0x1944   :  { %v2029_v7 = vpop.xlane.xlu0 %2028 }
0x1945   :  { %v2033_v9 = vmul.f32 0.03125, %v2029_v7 }
0x1947   :  { %v2035_v10 = vsub.f32 %v2021_v63, %v2033_v9  ;;  %v2871_v9 = vld [vmem:[%s3567_s24 + $0x8] sm:$0xff]  }
0x1948   :  { %v2032_v11 = vpop.xlane.xlu0 %2031 }
0x1949   :  { %v2034_v12 = vmul.f32 0.03125, %v2032_v11  ;;  %v2037_v13 = vmul.f32 %v2035_v10, %v2035_v10 }
0x194b   :  { %v2036_v15 = vsub.f32 %v2022_v4, %v2034_v12  ;;  %v2039_v5 = vsel %vm110_vm1, %v2037_v13, 0.0 }
0x194c   :  { %2040 = vadd.xlane.f32.xlu0 %v2039_v5 }
0x194d   :  { %v2038_v17 = vmul.f32 %v2036_v15, %v2036_v15 }
0x194f   :  { %v2042_v19 = vsel %vm110_vm1, %v2038_v17, 0.0 }
0x1950   :  { %2043 = vadd.xlane.f32.xlu0 %v2042_v19 }
0x19d5   :  { %v2041_v22 = vpop.xlane.xlu0 %2040 }
0x19d6   :  { %v2045_v23 = vmul.f32 0.03125, %v2041_v22 }
0x19d8   :  { %v2047_v24 = vadd.f32 1e-06, %v2045_v23 }
0x19d9   :  { %v2044_v25 = vpop.xlane.xlu0 %2043 }
0x19da   :  { %2925 = vrsqrt.f32 %v2047_v24  ;;  %v2046_v16 = vmul.f32 0.03125, %v2044_v25 }
0x19dc   :  { %v2048_v26 = vadd.f32 1e-06, %v2046_v16 }
0x19de   :  { %2927 = vrsqrt.f32 %v2048_v26 }
0x19e7   :  { %v2926_v27 = vpop.eup %2925 }
0x19e8   :  { %v2051_v28 = vmul.f32 %v2926_v27, %v2035_v10  ;;  %v2872_v10 = vld [vmem:[%s3567_s24] sm:$0xff]  }
0x19e9   :  { %v2504_v27 = vld [vmem:[%s3568_s25] ss:$0 sm:$0xff] }
0x19ea   :  { %v2059_v32 = vmul.f32 %v2474_v29, %v2051_v28 }
0x19eb   :  { %v2928_v30 = vpop.eup %2927 }
0x19ec   :  { %v2052_v31 = vmul.f32 %v2928_v30, %v2036_v15  ;;  %v2067_v35 = vadd.f32 %v2475_v33, %v2059_v32 }
0x19ee   :  { %v2060_v34 = vmul.f32 %v2474_v29, %v2052_v31 }
0x19f0   :  { %v2068_v36 = vadd.f32 %v2475_v33, %v2060_v34 }
0x19f2   :  { %v2069_v37 = vpack.c.bf16 %v2068_v36, %v2067_v35 }
0x19f4   :  { %2802 = vmatmul.mubr.msk.bf16.vlgmr.msra.gmra.mxu1 %vm110_vm1, %v2069_v37 }
0x19f5   :  { %2821 = vmatprep.mubr.msk.bf16.mxu1 %vm2956_vm0, %v2955_v1  ;;  %2818 = vmatpush3.bf16.msra.mxu1 %v2871_v9 }
0x19f6   :  { %2819 = vmatprep.subr.bf16.mxu1 %v2955_v1  ;;  %v2503_v1 = vld [vmem:[%s3566_s23 + $0x1] ss:$0 sm:$0xff]  ;;  %s2933_s23 = scalar_lea.vmem %s2351_s29, 256 }
0x19f7   :  { %p2934_p0 = scmp.ne.s32.totalorder %s2351_s29, %s2933_s23  ;;  %p2939_p2 = scmp.lt.s32.totalorder %s2933_s23, %s2933_s23 }
0x19f9   :  { %2820 = vmatpush3.bf16.msra.mxu1 %v2872_v10  ;;  %p2940_p3 = por %p2939_p2, %p2938_p1 }
0x19fb   :  { %p2941_p4 = pnand %p2940_p3, %p2934_p0 }
0x1ab4   :  { %v2132_v41 = vpop.f32.mrf.mxu1 }
0x1ab5   :  { %v2133_v42 = vadd.f32 %v2481_v40, %v2132_v41 }
0x1ab6   :  { %v2803_v18 = vpop.f32.mrf.mxu1 }
0x1ab7   :  { %v2139_v48 = vmax.f32 %v2133_v42, 0.0 }
0x1ab8   :  { %v2135_v43 = vpop.f32.mrf.mxu1 }
0x1ab9   :  { %v2136_v45 = vadd.f32 %v2481_v40, %v2135_v43 }
0x1aba   :  { %v2804_v46 = vpop.f32.mrf.mxu1 }
0x1abb   :  { %v2140_v49 = vmax.f32 %v2136_v45, 0.0 }
0x1abd   :  { %v2141_v50 = vpack.c.bf16 %v2140_v49, %v2139_v48 }
0x1abf   :  { %2814 = vmatmul.mubr.msk.bf16.vlgmr.msra.gmra.mxu0 %vm1220_vm3, %v2141_v50 }
0x1b7f   :  { %v2220_v52 = vpop.f32.mrf.mxu0 }
0x1b80   :  { %v2221_v53 = vadd.f32 %v2494_v51, %v2220_v52 }
0x1b81   :  { %v2815_v54 = vpop.f32.mrf.mxu0 }
0x1b82   :  { %v2227_v55 = vadd.f32 %v2221_v53, %v2067_v35 }
0x1b83   :  { %v2223_v57 = vpop.f32.mrf.mxu0 }
0x1b84   :  { %v2224_v58 = vadd.f32 %v2494_v51, %v2223_v57  ;;  %v2233_v44 = vsel %vm110_vm1, %v2227_v55, 0.0 }
0x1b85   :  { %2234 = vadd.xlane.f32.xlu0 %v2233_v44  ;;  %v2816_v59 = vpop.f32.mrf.mxu0 }
0x1b86   :  { %v2228_v60 = vadd.f32 %v2224_v58, %v2068_v36 }
0x1b88   :  { %v2236_v47 = vsel %vm110_vm1, %v2228_v60, 0.0 }
0x1b89   :  { %2237 = vadd.xlane.f32.xlu0 %v2236_v47 }
0x1c0e   :  { %v2235_v61 = vpop.xlane.xlu0 %2234 }
0x1c0f   :  { %v2239_v62 = vmul.f32 0.03125, %v2235_v61 }
0x1c11   :  { %v2241_v63 = vsub.f32 %v2227_v55, %v2239_v62 }
0x1c12   :  { %v2238_v0 = vpop.xlane.xlu0 %2237 }
0x1c13   :  { %v2240_v56 = vmul.f32 0.03125, %v2238_v0  ;;  %v2243_v2 = vmul.f32 %v2241_v63, %v2241_v63 }
0x1c15   :  { %v2242_v3 = vsub.f32 %v2228_v60, %v2240_v56  ;;  %v2245_v4 = vsel %vm110_vm1, %v2243_v2, 0.0 }
0x1c16   :  { %2246 = vadd.xlane.f32.xlu0 %v2245_v4 }
0x1c17   :  { %v2244_v6 = vmul.f32 %v2242_v3, %v2242_v3 }
0x1c19   :  { %v2248_v7 = vsel %vm110_vm1, %v2244_v6, 0.0 }
0x1c1a   :  { %2249 = vadd.xlane.f32.xlu0 %v2248_v7 }
0x1c9f   :  { %v2247_v11 = vpop.xlane.xlu0 %2246 }
0x1ca0   :  { %v2251_v12 = vmul.f32 0.03125, %v2247_v11 }
0x1ca2   :  { %v2253_v13 = vadd.f32 1e-06, %v2251_v12 }
0x1ca3   :  { %v2250_v15 = vpop.xlane.xlu0 %2249 }
0x1ca4   :  { %2929 = vrsqrt.f32 %v2253_v13  ;;  %v2252_v5 = vmul.f32 0.03125, %v2250_v15 }
0x1ca6   :  { %v2254_v17 = vadd.f32 1e-06, %v2252_v5 }
0x1ca8   :  { %2931 = vrsqrt.f32 %v2254_v17 }
0x1cb1   :  { %v2930_v19 = vpop.eup %2929 }
0x1cb2   :  { %v2257_v8 = vmul.f32 %v2930_v19, %v2241_v63 }
0x1cb4   :  { %v2265_v23 = vmul.f32 %v2502_v20, %v2257_v8 }
0x1cb5   :  { %v2932_v21 = vpop.eup %2931 }
0x1cb6   :  { %v2258_v22 = vmul.f32 %v2932_v21, %v2242_v3  ;;  %v2273_v25 = vadd.f32 %v2503_v1, %v2265_v23 }
0x1cb8   :  { %v2266_v24 = vmul.f32 %v2502_v20, %v2258_v22 }
0x1cba   :  { %v2274_v16 = vadd.f32 %v2503_v1, %v2266_v24 }
0x1cbc   :  { %v2275_v26 = vpack.c.bf16 %v2274_v16, %v2273_v25 }
0x1cbe   :  { %2822 = vmatmul.mubr.msk.bf16.vlgmr.msra.gmra.mxu1 %vm110_vm1, %v2275_v26 }
0x1d7e   :  { %v2336_v28 = vpop.f32.mrf.mxu1 }
0x1d7f   :  { %v2337_v29 = vadd.f32 %v2504_v27, %v2336_v28 }
0x1d80   :  { %v2823_v30 = vpop.f32.mrf.mxu1 }
0x1d81   :  { %2343 = vst.msk [vmem:[#allocation2] sm:$0xff] %vm110_vm1, %v2337_v29 }
0x1d82   :  { %v2339_v31 = vpop.f32.mrf.mxu1 }
0x1d83   :  { %v2340_v32 = vadd.f32 %v2504_v27, %v2339_v31 }
0x1d84   :  { %v2824_v33 = vpop.f32.mrf.mxu1 }
0x1d85   :  { %2344 = vst.msk [vmem:[#allocation2 + $0x8] sm:$0xff] %vm110_vm1, %v2340_v32 }
0x1d86   :  { %2944 = shalt.err (!%p2941_p4)
}
0x1d87   :  { %s2958_s25 = smov 128   ;;  %s2959_s0 = smov 8  }
0x1d88   :  { %2356 = dma.vmem_to_hbm [thread:$0]  %s2351_s29, 256, %s3569_s26, [#allocation3], %s2958_s25, %s2958_s25, %s2959_s0  }
0x1d89   :  { %2953 = dma.done.wait [#allocation3], 256  }
0x1d8a   :  { %2954 = vsyncadd [#allocation3], 4294967040 }
0x1d8b   :  { %2360 = vsyncpa [#allocation3], 1 }

</bundles_post_ra>
